<compile_context>
chip_gen: v5e
topology: v5e:2x2
jax: 0.10.0
libtpu: 0.0.40
codegen_flags: <defaults>
</compile_context>

<pallas_src>
import jax
import jax.numpy as jnp
from jax.experimental import pallas as pl
from jax.experimental.pallas import tpu as pltpu

HIDDEN = 1000  # hard-coded in the torch module


def _round_up(x, m):
    return (x + m - 1) // m * m


def _physical_vmem_bytes():
    """Best-effort physical VMEM query; conservative 64 MiB (v7x) fallback."""
    try:
        return int(pltpu.get_tpu_info().vmem_capacity_bytes)
    except Exception:
        return 64 * 1024 * 1024


def classifier_kernel(x_ref, w1_ref, b1_ref, w2_ref, b2_ref, o_ref, h_acc):
    """grid = (batch_tiles, k_tiles); the feature (K) reduction axis is innermost."""
    k = pl.program_id(1)

    @pl.when(k == 0)
    def _init():
        # Fold b1 into the accumulator init: no zero-fill + no separate bias add later.
        h_acc[...] = jnp.broadcast_to(b1_ref[...], h_acc.shape)

    # Partial first Linear: (tb, tk) @ (tk, Hp), bf16 MXU, f32 accumulate.
    h_acc[...] += jnp.dot(x_ref[...], w1_ref[...], preferred_element_type=jnp.float32)

    @pl.when(k == pl.num_programs(1) - 1)
    def _finalize():
        # ReLU(inplace=True) in f32 on the VPU (bias already folded in at init).
        h = jnp.maximum(h_acc[...], 0.0)
        # Dropout(0.5): identity in eval mode.
        # TODO(synk): training-mode dropout would use pltpu.prng_seed + pltpu.prng_random_bits
        #             with 1/(1-p) rescaling.
        out = jnp.dot(h.astype(w2_ref.dtype), w2_ref[...],
                      preferred_element_type=jnp.float32) + b2_ref[...]
        o_ref[...] = out.astype(o_ref.dtype)


def prepare_params(w1, b1, w2, b2, *, block_k=2048, compute_dtype=jnp.bfloat16):
    """Pad + cast the weights ONCE (hoisted out of the per-call forward)."""
    F, H = w1.shape
    C = w2.shape[1]
    assert w1.shape == (F, H) and b1.shape == (H,)
    assert w2.shape == (H, C) and b2.shape == (C,)

    Hp = _round_up(H, 128)   # 1000 -> 1024: lane-dense, unmasked vld/vst
    Cp = _round_up(C, 128)   # lane-dense output slab (no degenerate N=2 MXU pass)

    # Keep the K tile large: pad F to a multiple of block_k for real feature dims
    # (9216 / 25088 -> tk=2048), whole-F tile when F is small.
    if F <= block_k:
        Fp = _round_up(F, 128)
        tk = Fp
    else:
        Fp = _round_up(F, block_k)
        tk = block_k

    # Zero-padding is an exact no-op through matmul/ReLU (zero w1 cols -> h=0 -> ReLU 0;
    # zero w2 rows/cols contribute nothing; padded output cols sliced off in forward()).
    w1p = jnp.pad(w1, ((0, Fp - F), (0, Hp - H))).astype(compute_dtype)
    w2p = jnp.pad(w2, ((0, Hp - H), (0, Cp - C))).astype(compute_dtype)
    b1p = jnp.pad(b1, (0, Hp - H)).astype(jnp.float32).reshape(1, Hp)
    b2p = jnp.pad(b2, (0, Cp - C)).astype(jnp.float32).reshape(1, Cp)

    return dict(w1p=w1p, b1p=b1p, w2p=w2p, b2p=b2p,
                F=F, H=H, C=C, Fp=Fp, Hp=Hp, Cp=Cp, tk=tk,
                compute_dtype=compute_dtype)


def classifier_forward(x, params, *, block_b=None, training=False):
    if training:
        # TODO(synk): training-mode dropout (mask + 1/(1-p) rescale) not implemented.
        raise NotImplementedError("classifier_forward implements eval-mode dropout only")

    B, F = x.shape
    assert F == params["F"], f"feature dim mismatch: {F} vs {params['F']}"
    C, Fp, Hp, Cp, tk = params["C"], params["Fp"], params["Hp"], params["Cp"], params["tk"]
    compute_dtype = params["compute_dtype"]
    w1p, b1p, w2p, b2p = params["w1p"], params["b1p"], params["w2p"], params["b2p"]

    # Batch tile: minimize the number of batch tiles (each one re-streams all w1 K-tiles);
    # >=256 also fills the MXU M dimension on v6e/v7x. 16-sublane aligned for bf16 packing.
    if block_b is None:
        block_b = min(_round_up(B, 16), 512)
    block_b = _round_up(block_b, 16)
    Bp = _round_up(B, block_b)

    # Only the activation is padded/cast per call (cheap); weights were prepared once.
    xp = jnp.pad(x, ((0, Bp - B), (0, Fp - F))).astype(compute_dtype)

    grid = (Bp // block_b, Fp // tk)
    itemsize = jnp.dtype(compute_dtype).itemsize
    out_itemsize = jnp.dtype(x.dtype).itemsize

    cost = pl.CostEstimate(
        flops=2 * B * F * params["H"] + 2 * B * params["H"] * C,
        transcendentals=0,
        bytes_accessed=(Bp * Fp + Fp * Hp + Hp * Cp) * itemsize
        + (Hp + Cp) * 4 + Bp * Cp * out_itemsize,
    )

    # Per-step VMEM: double-buffered x / w1 / w2 / bias / out tiles + f32 accumulator.
    vmem_est = (
        2 * block_b * tk * itemsize        # x tiles
        + 2 * tk * Hp * itemsize           # w1 K-tiles
        + 2 * Hp * Cp * itemsize           # w2 (constant-index, still double-buffered)
        + 2 * (Hp + Cp) * 4                # biases
        + 2 * block_b * Cp * out_itemsize  # output tiles
        + block_b * Hp * 4                 # f32 accumulator
    )
    # Always set the limit (v5e default scoped limit is only 16 MiB); cap at ~90% of the
    # device's physical VMEM so the same config stays portable to v7x's 64 MiB.
    phys_cap = int(0.9 * _physical_vmem_bytes())
    vmem_limit = int(min(max(int(1.3 * vmem_est), 32 * 1024 * 1024), phys_cap))

    out_padded = pl.pallas_call(
        classifier_kernel,
        out_shape=jax.ShapeDtypeStruct((Bp, Cp), x.dtype),
        grid_spec=pltpu.PrefetchScalarGridSpec(
            num_scalar_prefetch=0,
            grid=grid,
            in_specs=[
                pl.BlockSpec((block_b, tk), lambda i, k: (i, k)),  # x tile (batch, K)
                pl.BlockSpec((tk, Hp), lambda i, k: (k, 0)),       # w1 K-tile (streamed)
                pl.BlockSpec((1, Hp), lambda i, k: (0, 0)),        # b1 (resident)
                pl.BlockSpec((Hp, Cp), lambda i, k: (0, 0)),       # w2 (resident)
                pl.BlockSpec((1, Cp), lambda i, k: (0, 0)),        # b2 (resident)
            ],
            out_specs=pl.BlockSpec((block_b, Cp), lambda i, k: (i, 0)),
            scratch_shapes=[pltpu.VMEM((block_b, Hp), jnp.float32)],
        ),
        compiler_params=pltpu.CompilerParams(
            # Batch axis "parallel" (pipelining / megacore); K reduction axis "arbitrary".
            # Note (v7x): with >=2 batch tiles megacore sharding re-streams w1 per TC — profile
            # before relying on it when already at HBM roofline.
            dimension_semantics=("parallel", "arbitrary"),
            vmem_limit_bytes=vmem_limit,
        ),
        cost_estimate=cost,
    )(xp, w1p, b1p, w2p, b2p)

    return out_padded[:B, :C]


def init_params(key, feature_dim, numclasses):
    # Deterministic synthetic init (torch nn.Linear default: U(-1/sqrt(fan_in), 1/sqrt(fan_in))).
    k1, k2, k3, k4 = jax.random.split(key, 4)
    bound1 = 1.0 / jnp.sqrt(feature_dim)
    bound2 = 1.0 / jnp.sqrt(HIDDEN)
    w1 = jax.random.uniform(k1, (feature_dim, HIDDEN), jnp.float32, -bound1, bound1)
    b1 = jax.random.uniform(k2, (HIDDEN,), jnp.float32, -bound1, bound1)
    w2 = jax.random.uniform(k3, (HIDDEN, numclasses), jnp.float32, -bound2, bound2)
    b2 = jax.random.uniform(k4, (numclasses,), jnp.float32, -bound2, bound2)
    return w1, b1, w2, b2


def reference_forward(x, w1, b1, w2, b2, compute_dtype=jnp.bfloat16):
    # Same bf16-multiply / f32-accumulate recipe as the kernel (dropout = identity in eval).
    h = jnp.dot(x.astype(compute_dtype), w1.astype(compute_dtype),
                preferred_element_type=jnp.float32) + b1
    h = jnp.maximum(h, 0.0)
    return jnp.dot(h.astype(compute_dtype), w2.astype(compute_dtype),
                   preferred_element_type=jnp.float32) + b2


if __name__ == "__main__":
    key = jax.random.PRNGKey(0)
    kx, kp = jax.random.split(key)

    batch = 8
    feature_dim = 512    # feature-extractor output dim (small synthetic choice)
    numclasses = 2       # cats vs dogs

    x = jax.random.normal(kx, (batch, feature_dim), jnp.float32)
    w1, b1, w2, b2 = init_params(kp, feature_dim, numclasses)

    # Weights are padded/cast ONCE, outside the forward pass.
    params = prepare_params(w1, b1, w2, b2)

    out = classifier_forward(x, params)
    out = jax.block_until_ready(out)

    ref = reference_forward(x, w1, b1, w2, b2)
    assert out.shape == (batch, numclasses)
    max_diff = jnp.max(jnp.abs(out - ref))
    assert jnp.allclose(out, ref, atol=1e-2, rtol=1e-2), f"mismatch vs reference: {max_diff}"

    print("KERNEL_OK")
</pallas_src>

<mosaic_0001>
module attributes {stable_mosaic.version = 11 : i64} {
  func.func @classifier_kernel(%arg0: i32, %arg1: i32, %arg2: memref<16x512xbf16, #tpu.memory_space<vmem>>, %arg3: memref<512x1024xbf16, #tpu.memory_space<vmem>>, %arg4: memref<1x1024xf32, #tpu.memory_space<vmem>>, %arg5: memref<1024x128xbf16, #tpu.memory_space<vmem>>, %arg6: memref<1x128xf32, #tpu.memory_space<vmem>>, %arg7: memref<16x128xf32, #tpu.memory_space<vmem>>, %arg8: memref<16x1024xf32, #tpu.memory_space<vmem>>) attributes {dimension_semantics = [#tpu.dimension_semantics<parallel>, #tpu.dimension_semantics<arbitrary>], iteration_bounds = array<i64: 1, 1>, scalar_prefetch = 0 : i64, scratch_operands = 1 : i64, tpu.core_type = #tpu.core_type<tc>, window_params = [{transform_indices = @transform_0, window_bounds = array<i64: 16, 512>}, {transform_indices = @transform_1, window_bounds = array<i64: 512, 1024>}, {pipeline_mode = #tpu.pipeline_mode<synchronous>, transform_indices = @transform_2, window_bounds = array<i64: 1, 1024>}, {pipeline_mode = #tpu.pipeline_mode<synchronous>, transform_indices = @transform_3, window_bounds = array<i64: 1024, 128>}, {pipeline_mode = #tpu.pipeline_mode<synchronous>, transform_indices = @transform_4, window_bounds = array<i64: 1, 128>}, {transform_indices = @transform_5, window_bounds = array<i64: 16, 128>}]} {
    %c0_i32 = arith.constant 0 : i32
    %0 = arith.cmpi eq, %arg1, %c0_i32 : i32
    %1 = arith.extui %0 : i1 to i32
    %c0_i32_0 = arith.constant 0 : i32
    %2 = arith.cmpi ne, %1, %c0_i32_0 : i32
    scf.if %2 {
      %c0_10 = arith.constant 0 : index
      %c0_11 = arith.constant 0 : index
      %12 = vector.load %arg4[%c0_10, %c0_11] : memref<1x1024xf32, #tpu.memory_space<vmem>>, vector<1x1024xf32>
      %13 = vector.shape_cast %12 : vector<1x1024xf32> to vector<1x1024xf32>
      %14 = vector.broadcast %13 : vector<1x1024xf32> to vector<16x1024xf32>
      %c0_12 = arith.constant 0 : index
      %c0_13 = arith.constant 0 : index
      %15 = vector.load %arg8[%c0_12, %c0_13] : memref<16x1024xf32, #tpu.memory_space<vmem>>, vector<16x1024xf32>
      tpu.vector_store %arg8[%c0_12, %c0_13], %14 {strides = array<i32>} : memref<16x1024xf32, #tpu.memory_space<vmem>>, vector<16x1024xf32>,
    } else {
    }
    %c0 = arith.constant 0 : index
    %c0_1 = arith.constant 0 : index
    %3 = vector.load %arg8[%c0, %c0_1] : memref<16x1024xf32, #tpu.memory_space<vmem>>, vector<16x1024xf32>
    %c0_2 = arith.constant 0 : index
    %c0_3 = arith.constant 0 : index
    %4 = vector.load %arg2[%c0_2, %c0_3] : memref<16x512xbf16, #tpu.memory_space<vmem>>, vector<16x512xbf16>
    %c0_4 = arith.constant 0 : index
    %c0_5 = arith.constant 0 : index
    %5 = vector.load %arg3[%c0_4, %c0_5] : memref<512x1024xbf16, #tpu.memory_space<vmem>>, vector<512x1024xbf16>
    %cst = arith.constant dense<0.000000e+00> : vector<16x1024xf32>
    %6 = tpu.matmul %4, %5, %cst {dimension_numbers = #tpu.dot_dimension_numbers<[1], [0], [0], [1], [0, 0, 1, 1], [], []>} : vector<16x512xbf16>, vector<512x1024xbf16>, vector<16x1024xf32> -> vector<16x1024xf32>
    %7 = arith.addf %3, %6 : vector<16x1024xf32>
    %c0_6 = arith.constant 0 : index
    %c0_7 = arith.constant 0 : index
    %8 = vector.load %arg8[%c0_6, %c0_7] : memref<16x1024xf32, #tpu.memory_space<vmem>>, vector<16x1024xf32>
    tpu.vector_store %arg8[%c0_6, %c0_7], %7 {strides = array<i32>} : memref<16x1024xf32, #tpu.memory_space<vmem>>, vector<16x1024xf32>,
    %c0_i32_8 = arith.constant 0 : i32
    %9 = arith.cmpi eq, %arg1, %c0_i32_8 : i32
    %10 = arith.extui %9 : i1 to i32
    %c0_i32_9 = arith.constant 0 : i32
    %11 = arith.cmpi ne, %10, %c0_i32_9 : i32
    scf.if %11 {
      %c0_10 = arith.constant 0 : index
      %c0_11 = arith.constant 0 : index
      %12 = vector.load %arg8[%c0_10, %c0_11] : memref<16x1024xf32, #tpu.memory_space<vmem>>, vector<16x1024xf32>
      %cst_12 = arith.constant 0.000000e+00 : f32
      %13 = vector.broadcast %cst_12 : f32 to vector<16x1024xf32>
      %14 = arith.maximumf %12, %13 : vector<16x1024xf32>
      %15 = arith.truncf %14 : vector<16x1024xf32> to vector<16x1024xbf16>
      %c0_13 = arith.constant 0 : index
      %c0_14 = arith.constant 0 : index
      %16 = vector.load %arg5[%c0_13, %c0_14] : memref<1024x128xbf16, #tpu.memory_space<vmem>>, vector<1024x128xbf16>
      %cst_15 = arith.constant dense<0.000000e+00> : vector<16x128xf32>
      %17 = tpu.matmul %15, %16, %cst_15 {dimension_numbers = #tpu.dot_dimension_numbers<[1], [0], [0], [1], [0, 0, 1, 1], [], []>} : vector<16x1024xbf16>, vector<1024x128xbf16>, vector<16x128xf32> -> vector<16x128xf32>
      %c0_16 = arith.constant 0 : index
      %c0_17 = arith.constant 0 : index
      %18 = vector.load %arg6[%c0_16, %c0_17] : memref<1x128xf32, #tpu.memory_space<vmem>>, vector<1x128xf32>
      %19 = vector.broadcast %18 : vector<1x128xf32> to vector<16x128xf32>
      %20 = arith.addf %17, %19 : vector<16x128xf32>
      %c0_18 = arith.constant 0 : index
      %c0_19 = arith.constant 0 : index
      %21 = vector.load %arg7[%c0_18, %c0_19] : memref<16x128xf32, #tpu.memory_space<vmem>>, vector<16x128xf32>
      tpu.vector_store %arg7[%c0_18, %c0_19], %20 {strides = array<i32>} : memref<16x128xf32, #tpu.memory_space<vmem>>, vector<16x128xf32>,
    } else {
    }
    return
  }
  func.func @transform_0(%arg0: i32, %arg1: i32) -> (i32, i32) {
    %c0_i32 = arith.constant 0 : i32
    return %arg0, %arg1 : i32, i32
  }
  func.func @transform_1(%arg0: i32, %arg1: i32) -> (i32, i32) {
    %c0_i32 = arith.constant 0 : i32
    %c0_i32_0 = arith.constant 0 : i32
    return %arg1, %c0_i32 : i32, i32
  }
  func.func @transform_2(%arg0: i32, %arg1: i32) -> (i32, i32) {
    %c0_i32 = arith.constant 0 : i32
    %c0_i32_0 = arith.constant 0 : i32
    %c0_i32_1 = arith.constant 0 : i32
    return %c0_i32, %c0_i32_0 : i32, i32
  }
  func.func @transform_3(%arg0: i32, %arg1: i32) -> (i32, i32) {
    %c0_i32 = arith.constant 0 : i32
    %c0_i32_0 = arith.constant 0 : i32
    %c0_i32_1 = arith.constant 0 : i32
    return %c0_i32, %c0_i32_0 : i32, i32
  }
  func.func @transform_4(%arg0: i32, %arg1: i32) -> (i32, i32) {
    %c0_i32 = arith.constant 0 : i32
    %c0_i32_0 = arith.constant 0 : i32
    %c0_i32_1 = arith.constant 0 : i32
    return %c0_i32, %c0_i32_0 : i32, i32
  }
  func.func @transform_5(%arg0: i32, %arg1: i32) -> (i32, i32) {
    %c0_i32 = arith.constant 0 : i32
    %c0_i32_0 = arith.constant 0 : i32
    return %arg0, %c0_i32 : i32, i32
  }
}

</mosaic_0001>

<bundles_post_ra>
// kernel: tpu_custom_call.1
= control target key start
LH: loop header
LB: loop body
LE: loop exit
PB: predicated region body
PF: predicated region fallthrough
CT: control target
= control target key end

     0   :  { %10 = vsyncpa [#allocation4], 0  ;;  %s4803_s0 = inlined_call_operand.hbm [shape: bf16[16,512], index: 0, kind: input, shape index: {}]   ;;  %s4804_s1 = inlined_call_operand.hbm [shape: bf16[512,1024], index: 1, kind: input, shape index: {}]   ;;  %s4805_s2 = inlined_call_operand.hbm [shape: f32[1,1024], index: 2, kind: input, shape index: {}]   ;;  %s4806_s3 = inlined_call_operand.hbm [shape: bf16[1024,128], index: 3, kind: input, shape index: {}]   ;;  %s4807_s4 = inlined_call_operand.vmem [shape: f32[1,128], index: 4, kind: input, shape index: {}]   ;;  %s4808_s5 = inlined_call_operand.hbm [shape: f32[16,128], index: 5, kind: output, shape index: {}]  }
   0x1   :  { %11 = vsyncpa [#allocation7], 0 }
   0x2   :  { %12 = vsyncpa [#allocation10], 0  ;;  %s31_s20 = sshll.u32 %s4804_s1, 4  ;;  %s32_s20 = int_to_ptr.hbm [resolvable:$true] %s31_s20 }
   0x3   :  { %13 = vsyncpa [#allocation5], 0  ;;  %s4632_s21 = smov [#allocation6]   ;;  %s18_s25 = sshll.u32 %s4803_s0, 4  ;;  %s19_s25 = int_to_ptr.hbm [resolvable:$true] %s18_s25 }
   0x4   :  { %s33_s22 = sshll.u32 %s4632_s21, 4  ;;  %s4633_s26 = smov 512   ;;  %s34_s22 = int_to_ptr.vmem [resolvable:$true] %s33_s22 }
   0x5   :  { %s4634_s27 = smov 32   ;;  %s4635_s28 = smov [#allocation3]  }
   0x6   :  { %39 = dma.hbm_to_vmem [thread:$0]  %s32_s20, 32768, %s34_s22, [#allocation7], %s4633_s26, %s4633_s26, %s4634_s27  }
   0x7   :  { %s20_s29 = sshll.u32 %s4635_s28, 4  ;;  %s4636_s30 = smov 256   ;;  %s21_s29 = int_to_ptr.vmem [resolvable:$true] %s20_s29 }
   0x8   :  { %s4637_s6 = smov 16   ;;  %s45_s8 = sshll.u32 %s4805_s2, 4  ;;  %s46_s8 = int_to_ptr.hbm [resolvable:$true] %s45_s8 }
   0x9   :  { %26 = dma.hbm_to_vmem [thread:$0]  %s19_s25, 512, %s21_s29, [#allocation4], %s4636_s30, %s4636_s30, %s4637_s6  }
   0xa   :  { %s4638_s9 = smov [#allocation8]   ;;  %s55_s12 = sshll.u32 %s4806_s3, 4  ;;  %s56_s12 = int_to_ptr.hbm [resolvable:$true] %s55_s12 }
   0xb   :  { %s47_s10 = sshll.u32 %s4638_s9, 4  ;;  %s4639_s13 = smov [#allocation9]   ;;  %s48_s10 = int_to_ptr.vmem [resolvable:$true] %s47_s10 }
   0xc   :  { %50 = dma.hbm_to_vmem [thread:$0]  %s46_s8, 128, %s48_s10, [#allocation7]  }
   0xd   :  { %s57_s14 = sshll.u32 %s4639_s13, 4  ;;  %s4640_s15 = smov 64   ;;  %s58_s14 = int_to_ptr.vmem [resolvable:$true] %s57_s14 }
   0xe   :  { %s4641_s16 = smov 4  }
   0xf   :  { %63 = dma.hbm_to_vmem [thread:$0]  %s56_s12, 8192, %s58_s14, [#allocation10], %s4640_s15, %s4640_s15, %s4641_s16  }
  0x10   :  { %4624 = dma.done.wait [#allocation4], 512  }
  0x11   :  { %4625 = vsyncadd [#allocation4], 4294966784 }
  0x12   :  { %4626 = dma.done.wait [#allocation7], 32896  }
  0x13   :  { %4627 = vsyncadd [#allocation7], 4294934400 }
  0x14   :  { %4628 = dma.done.wait [#allocation10], 8192  }
  0x15   :  { %4629 = vsyncadd [#allocation10], 4294959104  ;;  %v3112_v0 = vld [vmem:[#allocation6 + $0x1c0] sm:$0xf]  ;;  %s2855_s20 = sshll.u32 %s4808_s5, 4  ;;  %s4643_s21 = smov 128   ;;  %s2856_s20 = int_to_ptr.hbm [resolvable:$true] %s2855_s20 }
  0x16   :  { %v4230_v1 = vld [vmem:[#allocation6 + $0x1dc] sm:$0xf0]  ;;  %s4644_s22 = smov 8  }
  0x17   :  { %v3368_v2 = vld [vmem:[#allocation6 + $0x3c0] sm:$0xf]  ;;  %v3113_v3 = vor.u32 %v4230_v1, %v3112_v0 }
  0x18   :  { %v4294_v4 = vld [vmem:[#allocation6 + $0x3dc] sm:$0xf0] }
  0x19   :  { %v3624_v5 = vld [vmem:[#allocation6 + $0x5c0] sm:$0xf]  ;;  %v3369_v7 = vor.u32 %v4294_v4, %v3368_v2  ;;  %1696 = vmatpush.bf16.msra.mxu0 %v3113_v3 }
  0x1a   :  { %v4358_v6 = vld [vmem:[#allocation6 + $0x5dc] sm:$0xf0] }
  0x1b   :  { %v3625_v8 = vor.u32 %v4358_v6, %v3624_v5  ;;  %v3880_v9 = vld [vmem:[#allocation6 + $0x7c0] sm:$0xf]  ;;  %1710 = vmatpush.bf16.msra.mxu1 %v3369_v7 }
  0x1c   :  { %v4422_v10 = vld [vmem:[#allocation6 + $0x7dc] sm:$0xf0] }
  0x1d   :  { %v3080_v11 = vld [vmem:[#allocation6 + $0x180] sm:$0xf]  ;;  %v3881_v12 = vor.u32 %v4422_v10, %v3880_v9  ;;  %1724 = vmatpush.bf16.msra.mxu2 %v3625_v8 }
  0x1e   :  { %v4222_v13 = vld [vmem:[#allocation6 + $0x19c] sm:$0xf0] }
  0x1f   :  { %v3336_v14 = vld [vmem:[#allocation6 + $0x380] sm:$0xf]  ;;  %v3081_v16 = vor.u32 %v4222_v13, %v3080_v11  ;;  %1738 = vmatpush.bf16.msra.mxu3 %v3881_v12 }
  0x20   :  { %v4286_v15 = vld [vmem:[#allocation6 + $0x39c] sm:$0xf0] }
  0x21   :  { %v3337_v17 = vor.u32 %v4286_v15, %v3336_v14  ;;  %v3592_v18 = vld [vmem:[#allocation6 + $0x580] sm:$0xf]  ;;  %1697 = vmatpush.bf16.msra.mxu0 %v3081_v16 }
  0x22   :  { %v4350_v19 = vld [vmem:[#allocation6 + $0x59c] sm:$0xf0] }
  0x23   :  { %v3848_v20 = vld [vmem:[#allocation6 + $0x780] sm:$0xf]  ;;  %v3593_v21 = vor.u32 %v4350_v19, %v3592_v18  ;;  %1711 = vmatpush.bf16.msra.mxu1 %v3337_v17 }
  0x24   :  { %v4414_v22 = vld [vmem:[#allocation6 + $0x79c] sm:$0xf0] }
  0x25   :  { %v3048_v23 = vld [vmem:[#allocation6 + $0x140] sm:$0xf]  ;;  %v3849_v25 = vor.u32 %v4414_v22, %v3848_v20  ;;  %1725 = vmatpush.bf16.msra.mxu2 %v3593_v21 }
  0x26   :  { %v4214_v24 = vld [vmem:[#allocation6 + $0x15c] sm:$0xf0] }
  0x27   :  { %v3304_v26 = vld [vmem:[#allocation6 + $0x340] sm:$0xf]  ;;  %v3049_v29 = vor.u32 %v4214_v24, %v3048_v23  ;;  %1739 = vmatpush.bf16.msra.mxu3 %v3849_v25 }
  0x28   :  { %v4278_v27 = vld [vmem:[#allocation6 + $0x35c] sm:$0xf0] }
  0x29   :  { %v3560_v28 = vld [vmem:[#allocation6 + $0x540] sm:$0xf]  ;;  %v3305_v33 = vor.u32 %v4278_v27, %v3304_v26  ;;  %1698 = vmatpush.bf16.msra.mxu0 %v3049_v29  ;;  %v3114_v29 = vld [vmem:[#allocation6 + $0x1e0] sm:$0xf0] }
  0x2a   :  { %v4342_v30 = vld [vmem:[#allocation6 + $0x55c] sm:$0xf0] }
  0x2b   :  { %v3816_v31 = vld [vmem:[#allocation6 + $0x740] sm:$0xf]  ;;  %v3561_v34 = vor.u32 %v4342_v30, %v3560_v28  ;;  %1712 = vmatpush.bf16.msra.mxu1 %v3305_v33  ;;  %v4226_v28 = vld [vmem:[#allocation6 + $0x1c4] sm:$0xf] }
  0x2c   :  { %v4406_v32 = vld [vmem:[#allocation6 + $0x75c] sm:$0xf0]  ;;  %v4290_v30 = vld [vmem:[#allocation6 + $0x3c4] sm:$0xf] }
  0x2d   :  { %v3016_v35 = vld [vmem:[#allocation6 + $0x100] sm:$0xf]  ;;  %v3817_v38 = vor.u32 %v4406_v32, %v3816_v31  ;;  %1726 = vmatpush.bf16.msra.mxu2 %v3561_v34  ;;  %v3370_v32 = vld [vmem:[#allocation6 + $0x3e0] sm:$0xf0] }
  0x2e   :  { %v4206_v36 = vld [vmem:[#allocation6 + $0x11c] sm:$0xf0]  ;;  %v4354_v33 = vld [vmem:[#allocation6 + $0x5c4] sm:$0xf] }
  0x2f   :  { %v3272_v37 = vld [vmem:[#allocation6 + $0x300] sm:$0xf]  ;;  %v3017_v44 = vor.u32 %v4206_v36, %v3016_v35  ;;  %1740 = vmatpush.bf16.msra.mxu3 %v3817_v38  ;;  %v3626_v34 = vld [vmem:[#allocation6 + $0x5e0] sm:$0xf0] }
  0x30   :  { %v4270_v39 = vld [vmem:[#allocation6 + $0x31c] sm:$0xf0]  ;;  %v3882_v38 = vld [vmem:[#allocation6 + $0x7e0] sm:$0xf0] }
  0x31   :  { %v3528_v40 = vld [vmem:[#allocation6 + $0x500] sm:$0xf]  ;;  %v3273_v45 = vor.u32 %v4270_v39, %v3272_v37  ;;  %1699 = vmatpush.bf16.msra.mxu0 %v3017_v44  ;;  %v4418_v37 = vld [vmem:[#allocation6 + $0x7c4] sm:$0xf] }
  0x32   :  { %v4334_v41 = vld [vmem:[#allocation6 + $0x51c] sm:$0xf0]  ;;  %v3082_v44 = vld [vmem:[#allocation6 + $0x1a0] sm:$0xf0] }
  0x33   :  { %v3784_v42 = vld [vmem:[#allocation6 + $0x700] sm:$0xf]  ;;  %v3529_v46 = vor.u32 %v4334_v41, %v3528_v40  ;;  %1713 = vmatpush.bf16.msra.mxu1 %v3273_v45  ;;  %v3117_v40 = vor.u32 %v4226_v28, %v3114_v29  ;;  %v3373_v41 = vor.u32 %v4290_v30, %v3370_v32  ;;  %v4282_v45 = vld [vmem:[#allocation6 + $0x384] sm:$0xf]  ;;  %v2874_v28 = vld [vmem:[#allocation3 + $0x10] sm:$0xf0] }
  0x34   :  { %v4398_v43 = vld [vmem:[#allocation6 + $0x71c] sm:$0xf0]  ;;  %v3242_v30 = vld [vmem:[#allocation6 + $0x2e0] sm:$0xf0] }
  0x35   :  { %v2984_v47 = vld [vmem:[#allocation6 + $0xc0] sm:$0xf]  ;;  %v3785_v50 = vor.u32 %v4398_v43, %v3784_v42  ;;  %1727 = vmatpush.bf16.msra.mxu2 %v3529_v46  ;;  %v3629_v42 = vor.u32 %v4354_v33, %v3626_v34  ;;  %v4218_v43 = vld [vmem:[#allocation6 + $0x184] sm:$0xf]  ;;  %v3885_v46 = vor.u32 %v4418_v37, %v3882_v38 }
  0x36   :  { %v4198_v48 = vld [vmem:[#allocation6 + $0xdc] sm:$0xf0]  ;;  %v3498_v32 = vld [vmem:[#allocation6 + $0x4e0] sm:$0xf0] }
  0x37   :  { %v3240_v49 = vld [vmem:[#allocation6 + $0x2c0] sm:$0xf]  ;;  %v2985_v56 = vor.u32 %v4198_v48, %v2984_v47  ;;  %1741 = vmatpush.bf16.msra.mxu3 %v3785_v50  ;;  %v3338_v47 = vld [vmem:[#allocation6 + $0x3a0] sm:$0xf0] }
  0x38   :  { %v4262_v51 = vld [vmem:[#allocation6 + $0x2dc] sm:$0xf0]  ;;  %v4346_v48 = vld [vmem:[#allocation6 + $0x584] sm:$0xf] }
  0x39   :  { %v3496_v52 = vld [vmem:[#allocation6 + $0x4c0] sm:$0xf]  ;;  %v3241_v57 = vor.u32 %v4262_v51, %v3240_v49  ;;  %1700 = vmatpush.bf16.msra.mxu0 %v2985_v56  ;;  %v3594_v49 = vld [vmem:[#allocation6 + $0x5a0] sm:$0xf0] }
  0x3a   :  { %v4326_v53 = vld [vmem:[#allocation6 + $0x4dc] sm:$0xf0]  ;;  %v4410_v50 = vld [vmem:[#allocation6 + $0x784] sm:$0xf] }
  0x3b   :  { %v3752_v54 = vld [vmem:[#allocation6 + $0x6c0] sm:$0xf]  ;;  %v3497_v58 = vor.u32 %v4326_v53, %v3496_v52  ;;  %1714 = vmatpush.bf16.msra.mxu1 %v3241_v57  ;;  %v3850_v51 = vld [vmem:[#allocation6 + $0x7a0] sm:$0xf0]  ;;  %v3085_v52 = vor.u32 %v4218_v43, %v3082_v44  ;;  %v3341_v53 = vor.u32 %v4282_v45, %v3338_v47 }
  0x3c   :  { %v4390_v55 = vld [vmem:[#allocation6 + $0x6dc] sm:$0xf0]  ;;  %v3050_v56 = vld [vmem:[#allocation6 + $0x160] sm:$0xf0] }
  0x3d   :  { %v2952_v59 = vld [vmem:[#allocation6 + $0x80] sm:$0xf]  ;;  %v3753_v62 = vor.u32 %v4390_v55, %v3752_v54  ;;  %1728 = vmatpush.bf16.msra.mxu2 %v3497_v58  ;;  %v3597_v54 = vor.u32 %v4346_v48, %v3594_v49  ;;  %v4210_v55 = vld [vmem:[#allocation6 + $0x144] sm:$0xf]  ;;  %v3853_v58 = vor.u32 %v4410_v50, %v3850_v51 }
  0x3e   :  { %v4190_v60 = vld [vmem:[#allocation6 + $0x9c] sm:$0xf0]  ;;  %v4274_v57 = vld [vmem:[#allocation6 + $0x344] sm:$0xf] }
  0x3f   :  { %v3208_v61 = vld [vmem:[#allocation6 + $0x280] sm:$0xf]  ;;  %v2953_v4 = vor.u32 %v4190_v60, %v2952_v59  ;;  %1742 = vmatpush.bf16.msra.mxu3 %v3753_v62  ;;  %v3306_v59 = vld [vmem:[#allocation6 + $0x360] sm:$0xf0] }
  0x40   :  { %v4254_v63 = vld [vmem:[#allocation6 + $0x29c] sm:$0xf0]  ;;  %v4338_v60 = vld [vmem:[#allocation6 + $0x544] sm:$0xf] }
  0x41   :  { %v3464_v0 = vld [vmem:[#allocation6 + $0x480] sm:$0xf]  ;;  %v3209_v5 = vor.u32 %v4254_v63, %v3208_v61  ;;  %1701 = vmatpush.bf16.msra.mxu0 %v2953_v4  ;;  %v3562_v61 = vld [vmem:[#allocation6 + $0x560] sm:$0xf0]  ;;  %v4169_v4 = vld [vmem:[#allocation3 + $0x14] sm:$0xf0] }
  0x42   :  { %v4318_v1 = vld [vmem:[#allocation6 + $0x49c] sm:$0xf0]  ;;  %v4402_v62 = vld [vmem:[#allocation6 + $0x744] sm:$0xf] }
  0x43   :  { %v3720_v2 = vld [vmem:[#allocation6 + $0x680] sm:$0xf]  ;;  %v3465_v6 = vor.u32 %v4318_v1, %v3464_v0  ;;  %1715 = vmatpush.bf16.msra.mxu1 %v3209_v5  ;;  %v3818_v63 = vld [vmem:[#allocation6 + $0x760] sm:$0xf0]  ;;  %v3053_v1 = vor.u32 %v4210_v55, %v3050_v56  ;;  %v3309_v5 = vor.u32 %v4274_v57, %v3306_v59 }
  0x44   :  { %v4382_v3 = vld [vmem:[#allocation6 + $0x69c] sm:$0xf0]  ;;  %v4202_v0 = vld [vmem:[#allocation6 + $0x104] sm:$0xf] }
  0x45   :  { %v2920_v7 = vld [vmem:[#allocation6 + $0x40] sm:$0xf]  ;;  %v3721_v10 = vor.u32 %v4382_v3, %v3720_v2  ;;  %1729 = vmatpush.bf16.msra.mxu2 %v3465_v6  ;;  %v3018_v2 = vld [vmem:[#allocation6 + $0x120] sm:$0xf0]  ;;  %v2880_v3 = vld [vmem:[#allocation3 + $0x8] sm:$0xf]  ;;  %v3565_v6 = vor.u32 %v4338_v60, %v3562_v61 }
  0x46   :  { %v4182_v8 = vld [vmem:[#allocation6 + $0x5c] sm:$0xf0]  ;;  %v4386_v34 = vld [vmem:[#allocation6 + $0x6c4] sm:$0xf] }
  0x47   :  { %v3176_v9 = vld [vmem:[#allocation6 + $0x240] sm:$0xf]  ;;  %v2921_v16 = vor.u32 %v4182_v8, %v2920_v7  ;;  %1743 = vmatpush.bf16.msra.mxu3 %v3721_v10  ;;  %v4266_v7 = vld [vmem:[#allocation6 + $0x304] sm:$0xf]  ;;  %v4687_v8 = vor.u32 %v4169_v4, %v2880_v3  ;;  %v2882_v10 = vld [vmem:[#allocation3 + $0x18] sm:$0xf0] }
  0x48   :  { %v4246_v11 = vld [vmem:[#allocation6 + $0x25c] sm:$0xf0]  ;;  %v3210_v43 = vld [vmem:[#allocation6 + $0x2a0] sm:$0xf0] }
  0x49   :  { %v3432_v12 = vld [vmem:[#allocation6 + $0x440] sm:$0xf]  ;;  %v3177_v19 = vor.u32 %v4246_v11, %v3176_v9  ;;  %1702 = vmatpush.bf16.msra.mxu0 %v2921_v16  ;;  %v4167_v9 = vld [vmem:[#allocation3 + $0xc] sm:$0xf]  ;;  %v3821_v11 = vor.u32 %v4402_v62, %v3818_v63  ;;  %v4394_v16 = vld [vmem:[#allocation6 + $0x704] sm:$0xf] }
  0x4a   :  { %v4310_v13 = vld [vmem:[#allocation6 + $0x45c] sm:$0xf0]  ;;  %v4314_v44 = vld [vmem:[#allocation6 + $0x484] sm:$0xf] }
  0x4b   :  { %v3688_v14 = vld [vmem:[#allocation6 + $0x640] sm:$0xf]  ;;  %v3433_v20 = vor.u32 %v4310_v13, %v3432_v12  ;;  %1716 = vmatpush.bf16.msra.mxu1 %v3177_v19  ;;  %v3274_v12 = vld [vmem:[#allocation6 + $0x320] sm:$0xf0]  ;;  %v3021_v19 = vor.u32 %v4202_v0, %v3018_v2 }
  0x4c   :  { %v4374_v15 = vld [vmem:[#allocation6 + $0x65c] sm:$0xf0]  ;;  %v4330_v13 = vld [vmem:[#allocation6 + $0x504] sm:$0xf] }
  0x4d   :  { %v2888_v17 = vld [vmem:[#allocation6] sm:$0xf]  ;;  %v3689_v24 = vor.u32 %v4374_v15, %v3688_v14  ;;  %1730 = vmatpush.bf16.msra.mxu2 %v3433_v20  ;;  %v3530_v14 = vld [vmem:[#allocation6 + $0x520] sm:$0xf0]  ;;  %v4689_v15 = vor.u32 %v4167_v9, %v2882_v10  ;;  %v3120_v9 = vld [vmem:[#allocation6 + $0x1c8] sm:$0xf] }
  0x4e   :  { %v4174_v18 = vld [vmem:[#allocation6 + $0x1c] sm:$0xf0]  ;;  %v2986_v20 = vld [vmem:[#allocation6 + $0xe0] sm:$0xf0]  ;;  %v4231_v10 = vld [vmem:[#allocation6 + $0x1e4] sm:$0xf0] }
  0x4f   :  { %v3144_v21 = vld [vmem:[#allocation6 + $0x200] sm:$0xf]  ;;  %v2889_v31 = vor.u32 %v4174_v18, %v2888_v17  ;;  %1744 = vmatpush.bf16.msra.mxu3 %v3689_v24  ;;  %v3786_v17 = vld [vmem:[#allocation6 + $0x720] sm:$0xf0]  ;;  %v3533_v24 = vor.u32 %v4330_v13, %v3530_v14  ;;  %v4295_v13 = vld [vmem:[#allocation6 + $0x3e4] sm:$0xf0] }
  0x50   :  { %v4238_v22 = vld [vmem:[#allocation6 + $0x21c] sm:$0xf0]  ;;  %v4194_v18 = vld [vmem:[#allocation6 + $0xc4] sm:$0xf]  ;;  %v3789_v29 = vor.u32 %v4394_v16, %v3786_v17  ;;  %v3632_v14 = vld [vmem:[#allocation6 + $0x5c8] sm:$0xf] }
  0x51   :  { %v3400_v23 = vld [vmem:[#allocation6 + $0x400] sm:$0xf]  ;;  %v3145_v35 = vor.u32 %v4238_v22, %v3144_v21  ;;  %1703 = vmatpush.bf16.msra.mxu0 %v2889_v31  ;;  %v4168_v22 = vld [vmem:[#allocation3 + $0xc] sm:$0xf0]  ;;  %v4322_v31 = vld [vmem:[#allocation6 + $0x4c4] sm:$0xf] }
  0x52   :  { %v4302_v25 = vld [vmem:[#allocation6 + $0x41c] sm:$0xf0]  ;;  %v3501_v38 = vor.u32 %v4322_v31, %v3498_v32  ;;  %v3466_v45 = vld [vmem:[#allocation6 + $0x4a0] sm:$0xf0]  ;;  %v4359_v16 = vld [vmem:[#allocation6 + $0x5e4] sm:$0xf0] }
  0x53   :  { %v3656_v26 = vld [vmem:[#allocation6 + $0x600] sm:$0xf]  ;;  %v3401_v36 = vor.u32 %v4302_v25, %v3400_v23  ;;  %1717 = vmatpush.bf16.msra.mxu1 %v3145_v35  ;;  %v3277_v23 = vor.u32 %v4266_v7, %v3274_v12  ;;  %v4258_v25 = vld [vmem:[#allocation6 + $0x2c4] sm:$0xf]  ;;  %v3469_v50 = vor.u32 %v4314_v44, %v3466_v45  ;;  %v3600_v31 = vld [vmem:[#allocation6 + $0x588] sm:$0xf] }
  0x54   :  { %v4366_v27 = vld [vmem:[#allocation6 + $0x61c] sm:$0xf0]  ;;  %v3754_v35 = vld [vmem:[#allocation6 + $0x6e0] sm:$0xf0]  ;;  %v3245_v37 = vor.u32 %v4258_v25, %v3242_v30  ;;  %v3088_v25 = vld [vmem:[#allocation6 + $0x188] sm:$0xf] }
  0x55   :  { %v3657_v39 = vor.u32 %v4366_v27, %v3656_v26  ;;  %1731 = vmatpush.bf16.msra.mxu2 %v3401_v36  ;;  %1752 = vmatpush.bf16.msrb.mxu0 %v3117_v40  ;;  %v2872_v21 = vld [vmem:[#allocation3] sm:$0xf]  ;;  %v4166_v27 = vld [vmem:[#allocation3 + $0x4] sm:$0xf]  ;;  %v2989_v36 = vor.u32 %v4194_v18, %v2986_v20  ;;  %v4423_v20 = vld [vmem:[#allocation6 + $0x7e4] sm:$0xf0] }
  0x56   :  { %v4693_v26 = vor.u32 %v4168_v22, %v2872_v21  ;;  %v4695_v33 = vor.u32 %v4166_v27, %v2874_v28  ;;  %v2954_v40 = vld [vmem:[#allocation6 + $0xa0] sm:$0xf0]  ;;  %v3121_v22 = vor.u32 %v4231_v10, %v3120_v9  ;;  %v4223_v27 = vld [vmem:[#allocation6 + $0x1a4] sm:$0xf0] }
  0x57   :  { %1745 = vmatpush.bf16.msra.mxu3 %v3657_v39  ;;  %1766 = vmatpush.bf16.msrb.mxu1 %v3373_v41  ;;  %v4186_v39 = vld [vmem:[#allocation6 + $0x84] sm:$0xf]  ;;  %v3344_v28 = vld [vmem:[#allocation6 + $0x388] sm:$0xf] }
  0x58   :  { %1732 = vmatmul.bf16.vlgmr.msra.gmra.mxu2 %v4687_v8  ;;  %1704 = vmatmul.bf16.vlgmr.msra.gmra.mxu0 %v4693_v26  ;;  %v4250_v41 = vld [vmem:[#allocation6 + $0x284] sm:$0xf]  ;;  %v2957_v48 = vor.u32 %v4186_v39, %v2954_v40  ;;  %v4287_v30 = vld [vmem:[#allocation6 + $0x3a4] sm:$0xf0] }
  0x59   :  { %1780 = vmatpush.bf16.msrb.mxu2 %v3629_v42  ;;  %1753 = vmatpush.bf16.msrb.mxu0 %v3085_v52  ;;  %v3757_v42 = vor.u32 %v4386_v34, %v3754_v35  ;;  %v3722_v47 = vld [vmem:[#allocation6 + $0x6a0] sm:$0xf0]  ;;  %v3213_v49 = vor.u32 %v4250_v41, %v3210_v43  ;;  %v4351_v32 = vld [vmem:[#allocation6 + $0x5a4] sm:$0xf0] }
  0x5a   :  { %1746 = vmatmul.bf16.vlgmr.msra.gmra.mxu3 %v4689_v15  ;;  %1718 = vmatmul.bf16.vlgmr.msra.gmra.mxu1 %v4695_v33  ;;  %v4178_v51 = vld [vmem:[#allocation6 + $0x44] sm:$0xf]  ;;  %v3856_v34 = vld [vmem:[#allocation6 + $0x788] sm:$0xf] }
  0x5b   :  { %1794 = vmatpush.bf16.msrb.mxu3 %v3885_v46  ;;  %1767 = vmatpush.bf16.msrb.mxu1 %v3341_v53  ;;  %v4378_v46 = vld [vmem:[#allocation6 + $0x684] sm:$0xf]  ;;  %v4415_v35 = vld [vmem:[#allocation6 + $0x7a4] sm:$0xf0] }
  0x5c   :  { %v2922_v52 = vld [vmem:[#allocation6 + $0x60] sm:$0xf0]  ;;  %v3056_v39 = vld [vmem:[#allocation6 + $0x148] sm:$0xf] }
  0x5d   :  { %1781 = vmatpush.bf16.msrb.mxu2 %v3597_v54  ;;  %1754 = vmatpush.bf16.msrb.mxu0 %v3053_v1  ;;  %v4242_v53 = vld [vmem:[#allocation6 + $0x244] sm:$0xf]  ;;  %v3725_v54 = vor.u32 %v4378_v46, %v3722_v47  ;;  %v2925_v60 = vor.u32 %v4178_v51, %v2922_v52  ;;  %v4215_v40 = vld [vmem:[#allocation6 + $0x164] sm:$0xf0] }
  0x5e   :  { %v3178_v55 = vld [vmem:[#allocation6 + $0x260] sm:$0xf0]  ;;  %v3312_v41 = vld [vmem:[#allocation6 + $0x348] sm:$0xf] }
  0x5f   :  { %1795 = vmatpush.bf16.msrb.mxu3 %v3853_v58  ;;  %1768 = vmatpush.bf16.msrb.mxu1 %v3309_v5  ;;  %v4306_v56 = vld [vmem:[#allocation6 + $0x444] sm:$0xf]  ;;  %v3181_v63 = vor.u32 %v4242_v53, %v3178_v55  ;;  %v4279_v43 = vld [vmem:[#allocation6 + $0x364] sm:$0xf0] }
  0x60   :  { %v3434_v57 = vld [vmem:[#allocation6 + $0x460] sm:$0xf0]  ;;  %v3568_v44 = vld [vmem:[#allocation6 + $0x548] sm:$0xf] }
  0x61   :  { %1782 = vmatpush.bf16.msrb.mxu2 %v3565_v6  ;;  %1755 = vmatpush.bf16.msrb.mxu0 %v3021_v19  ;;  %v4370_v58 = vld [vmem:[#allocation6 + $0x644] sm:$0xf]  ;;  %v3437_v0 = vor.u32 %v4306_v56, %v3434_v57  ;;  %v3888_v19 = vld [vmem:[#allocation6 + $0x7c8] sm:$0xf] }
  0x62   :  { %v3690_v59 = vld [vmem:[#allocation6 + $0x660] sm:$0xf0]  ;;  %v4343_v45 = vld [vmem:[#allocation6 + $0x564] sm:$0xf0] }
  0x63   :  { %1796 = vmatpush.bf16.msrb.mxu3 %v3821_v11  ;;  %1769 = vmatpush.bf16.msrb.mxu1 %v3277_v23  ;;  %v4170_v61 = vld [vmem:[#allocation6 + $0x4] sm:$0xf]  ;;  %v3693_v4 = vor.u32 %v4370_v58, %v3690_v59  ;;  %v3376_v11 = vld [vmem:[#allocation6 + $0x3c8] sm:$0xf] }
  0x64   :  { %v2890_v62 = vld [vmem:[#allocation6 + $0x20] sm:$0xf0]  ;;  %v3377_v23 = vor.u32 %v4295_v13, %v3376_v11  ;;  %v3824_v46 = vld [vmem:[#allocation6 + $0x748] sm:$0xf] }
  0x65   :  { %1783 = vmatpush.bf16.msrb.mxu2 %v3533_v24  ;;  %1756 = vmatpush.bf16.msrb.mxu0 %v2989_v36  ;;  %v4234_v1 = vld [vmem:[#allocation6 + $0x204] sm:$0xf]  ;;  %v2893_v12 = vor.u32 %v4170_v61, %v2890_v62  ;;  %v3633_v24 = vor.u32 %v4359_v16, %v3632_v14  ;;  %v3089_v36 = vor.u32 %v4223_v27, %v3088_v25  ;;  %v4407_v47 = vld [vmem:[#allocation6 + $0x764] sm:$0xf0] }
  0x66   :  { %v3146_v2 = vld [vmem:[#allocation6 + $0x220] sm:$0xf0]  ;;  %v3024_v51 = vld [vmem:[#allocation6 + $0x108] sm:$0xf] }
  0x67   :  { %1797 = vmatpush.bf16.msrb.mxu3 %v3789_v29  ;;  %1770 = vmatpush.bf16.msrb.mxu1 %v3245_v37  ;;  %v4298_v3 = vld [vmem:[#allocation6 + $0x404] sm:$0xf]  ;;  %v3149_v17 = vor.u32 %v4234_v1, %v3146_v2  ;;  %v3889_v29 = vor.u32 %v4423_v20, %v3888_v19  ;;  %v3345_v37 = vor.u32 %v4287_v30, %v3344_v28  ;;  %v4207_v52 = vld [vmem:[#allocation6 + $0x124] sm:$0xf0] }
  0x68   :  { %v3402_v5 = vld [vmem:[#allocation6 + $0x420] sm:$0xf0]  ;;  %v3280_v53 = vld [vmem:[#allocation6 + $0x308] sm:$0xf] }
  0x69   :  { %1784 = vmatpush.bf16.msrb.mxu2 %v3501_v38  ;;  %1757 = vmatpush.bf16.msrb.mxu0 %v2957_v48  ;;  %v4362_v6 = vld [vmem:[#allocation6 + $0x604] sm:$0xf]  ;;  %v3405_v18 = vor.u32 %v4298_v3, %v3402_v5  ;;  %v3601_v38 = vor.u32 %v4351_v32, %v3600_v31  ;;  %v3057_v48 = vor.u32 %v4215_v40, %v3056_v39  ;;  %v4271_v55 = vld [vmem:[#allocation6 + $0x324] sm:$0xf0] }
  0x6a   :  { %v3658_v7 = vld [vmem:[#allocation6 + $0x620] sm:$0xf0]  ;;  %v3536_v56 = vld [vmem:[#allocation6 + $0x508] sm:$0xf]  ;;  %v3281_v61 = vor.u32 %v4271_v55, %v3280_v53  ;;  %v4355_v53 = vld [vmem:[#allocation6 + $0x5cc] sm:$0xf] }
  0x6b   :  { %1798 = vmatpush.bf16.msrb.mxu3 %v3757_v42  ;;  %1771 = vmatpush.bf16.msrb.mxu1 %v3213_v49  ;;  %v3661_v21 = vor.u32 %v4362_v6, %v3658_v7  ;;  %v3857_v42 = vor.u32 %v4415_v35, %v3856_v34  ;;  %v3313_v49 = vor.u32 %v4279_v43, %v3312_v41  ;;  %v4335_v57 = vld [vmem:[#allocation6 + $0x524] sm:$0xf0] }
  0x6c   :  { %v3792_v58 = vld [vmem:[#allocation6 + $0x708] sm:$0xf]  ;;  %v3537_v62 = vor.u32 %v4335_v57, %v3536_v56  ;;  %v4419_v57 = vld [vmem:[#allocation6 + $0x7cc] sm:$0xf] }
  0x6d   :  { %1785 = vmatpush.bf16.msrb.mxu2 %v3469_v50  ;;  %1758 = vmatpush.bf16.msrb.mxu0 %v2925_v60  ;;  %v3569_v50 = vor.u32 %v4343_v45, %v3568_v44  ;;  %v4399_v59 = vld [vmem:[#allocation6 + $0x724] sm:$0xf0]  ;;  %v3025_v60 = vor.u32 %v4207_v52, %v3024_v51  ;;  %v3378_v52 = vld [vmem:[#allocation6 + $0x3e8] sm:$0xf0] }
  0x6e   :  { %v3248_v1 = vld [vmem:[#allocation6 + $0x2c8] sm:$0xf]  ;;  %v3793_v2 = vor.u32 %v4399_v59, %v3792_v58  ;;  %v3890_v58 = vld [vmem:[#allocation6 + $0x7e8] sm:$0xf0] }
  0x6f   :  { %1799 = vmatpush.bf16.msrb.mxu3 %v3725_v54  ;;  %1772 = vmatpush.bf16.msrb.mxu1 %v3181_v63  ;;  %v3825_v54 = vor.u32 %v4407_v47, %v3824_v46  ;;  %v2992_v63 = vld [vmem:[#allocation6 + $0xc8] sm:$0xf] }
  0x70   :  { %v4263_v3 = vld [vmem:[#allocation6 + $0x2e4] sm:$0xf0] }
  0x71   :  { %1786 = vmatpush.bf16.msrb.mxu2 %v3437_v0  ;;  %1759 = vmatpush.bf16.msrb.mxu0 %v2893_v12  ;;  %v4199_v0 = vld [vmem:[#allocation6 + $0xe4] sm:$0xf0]  ;;  %v3249_v10 = vor.u32 %v4263_v3, %v3248_v1  ;;  %v4283_v1 = vld [vmem:[#allocation6 + $0x38c] sm:$0xf] }
  0x72   :  { %v4327_v5 = vld [vmem:[#allocation6 + $0x4e4] sm:$0xf0]  ;;  %v2993_v9 = vor.u32 %v4199_v0, %v2992_v63  ;;  %v4219_v63 = vld [vmem:[#allocation6 + $0x18c] sm:$0xf] }
  0x73   :  { %1800 = vmatpush.bf16.msrb.mxu3 %v3693_v4  ;;  %1773 = vmatpush.bf16.msrb.mxu1 %v3149_v17  ;;  %v3504_v4 = vld [vmem:[#allocation6 + $0x4c8] sm:$0xf]  ;;  %v3090_v0 = vld [vmem:[#allocation6 + $0x1a8] sm:$0xf0] }
  0x74   :  { %1760 = vmatmul.bf16.vlgmr.msrb.gmra.mxu0 %v4693_v26  ;;  %v3760_v6 = vld [vmem:[#allocation6 + $0x6c8] sm:$0xf]  ;;  %v3505_v11 = vor.u32 %v4327_v5, %v3504_v4  ;;  %v3346_v3 = vld [vmem:[#allocation6 + $0x3a8] sm:$0xf0] }
  0x75   :  { %1787 = vmatpush.bf16.msrb.mxu2 %v3405_v18  ;;  %1808 = vmatpush.bf16.msra.mxu0 %v3121_v22  ;;  %v4391_v7 = vld [vmem:[#allocation6 + $0x6e4] sm:$0xf0]  ;;  %v4347_v4 = vld [vmem:[#allocation6 + $0x58c] sm:$0xf] }
  0x76   :  { %1774 = vmatmul.bf16.vlgmr.msrb.gmra.mxu1 %v4695_v33  ;;  %v2960_v12 = vld [vmem:[#allocation6 + $0x88] sm:$0xf]  ;;  %v3761_v16 = vor.u32 %v4391_v7, %v3760_v6  ;;  %v3602_v5 = vld [vmem:[#allocation6 + $0x5a8] sm:$0xf0] }
  0x77   :  { %1801 = vmatpush.bf16.msrb.mxu3 %v3661_v21  ;;  %1822 = vmatpush.bf16.msra.mxu1 %v3377_v23  ;;  %v4191_v13 = vld [vmem:[#allocation6 + $0xa4] sm:$0xf0]  ;;  %v4411_v6 = vld [vmem:[#allocation6 + $0x78c] sm:$0xf] }
  0x78   :  { %1788 = vmatmul.bf16.vlgmr.msrb.gmra.mxu2 %v4687_v8  ;;  %v3216_v14 = vld [vmem:[#allocation6 + $0x288] sm:$0xf]  ;;  %v2961_v22 = vor.u32 %v4191_v13, %v2960_v12  ;;  %v3858_v7 = vld [vmem:[#allocation6 + $0x7a8] sm:$0xf0] }
  0x79   :  { %1836 = vmatpush.bf16.msra.mxu2 %v3633_v24  ;;  %1809 = vmatpush.bf16.msra.mxu0 %v3089_v36  ;;  %v4255_v17 = vld [vmem:[#allocation6 + $0x2a4] sm:$0xf0]  ;;  %v4211_v12 = vld [vmem:[#allocation6 + $0x14c] sm:$0xf] }
  0x7a   :  { %1802 = vmatmul.bf16.vlgmr.msrb.gmra.mxu3 %v4689_v15  ;;  %v3472_v18 = vld [vmem:[#allocation6 + $0x488] sm:$0xf]  ;;  %v3217_v23 = vor.u32 %v4255_v17, %v3216_v14  ;;  %v3058_v13 = vld [vmem:[#allocation6 + $0x168] sm:$0xf0] }
  0x7b   :  { %1850 = vmatpush.bf16.msra.mxu3 %v3889_v29  ;;  %1823 = vmatpush.bf16.msra.mxu1 %v3345_v37  ;;  %v4319_v19 = vld [vmem:[#allocation6 + $0x4a4] sm:$0xf0]  ;;  %v4275_v14 = vld [vmem:[#allocation6 + $0x34c] sm:$0xf] }
  0x7c   :  { %v3728_v20 = vld [vmem:[#allocation6 + $0x688] sm:$0xf]  ;;  %v3473_v24 = vor.u32 %v4319_v19, %v3472_v18  ;;  %v3314_v17 = vld [vmem:[#allocation6 + $0x368] sm:$0xf0] }
  0x7d   :  { %1837 = vmatpush.bf16.msra.mxu2 %v3601_v38  ;;  %1810 = vmatpush.bf16.msra.mxu0 %v3057_v48  ;;  %v4383_v21 = vld [vmem:[#allocation6 + $0x6a4] sm:$0xf0]  ;;  %v4227_v48 = vld [vmem:[#allocation6 + $0x1cc] sm:$0xf] }
  0x7e   :  { %v2928_v25 = vld [vmem:[#allocation6 + $0x48] sm:$0xf]  ;;  %v3729_v29 = vor.u32 %v4383_v21, %v3728_v20  ;;  %v4339_v18 = vld [vmem:[#allocation6 + $0x54c] sm:$0xf] }
  0x7f   :  { %1851 = vmatpush.bf16.msra.mxu3 %v3857_v42  ;;  %1824 = vmatpush.bf16.msra.mxu1 %v3313_v49  ;;  %v4183_v27 = vld [vmem:[#allocation6 + $0x64] sm:$0xf0]  ;;  %v3122_v49 = vld [vmem:[#allocation6 + $0x1e8] sm:$0xf0] }
  0x80   :  { %v3184_v28 = vld [vmem:[#allocation6 + $0x248] sm:$0xf]  ;;  %v2929_v36 = vor.u32 %v4183_v27, %v2928_v25  ;;  %v3570_v19 = vld [vmem:[#allocation6 + $0x568] sm:$0xf0] }
  0x81   :  { %1838 = vmatpush.bf16.msra.mxu2 %v3569_v50  ;;  %1811 = vmatpush.bf16.msra.mxu0 %v3025_v60  ;;  %v4247_v30 = vld [vmem:[#allocation6 + $0x264] sm:$0xf0]  ;;  %v4291_v50 = vld [vmem:[#allocation6 + $0x3cc] sm:$0xf]  ;;  %v3125_v60 = vor.u32 %v4227_v48, %v3122_v49 }
  0x82   :  { %v3440_v31 = vld [vmem:[#allocation6 + $0x448] sm:$0xf]  ;;  %v3185_v39 = vor.u32 %v4247_v30, %v3184_v28  ;;  %v4403_v20 = vld [vmem:[#allocation6 + $0x74c] sm:$0xf] }
  0x83   :  { %1852 = vmatpush.bf16.msra.mxu3 %v3825_v54  ;;  %1825 = vmatpush.bf16.msra.mxu1 %v3281_v61  ;;  %v4311_v32 = vld [vmem:[#allocation6 + $0x464] sm:$0xf0]  ;;  %v3634_v54 = vld [vmem:[#allocation6 + $0x5e8] sm:$0xf0]  ;;  %v3381_v61 = vor.u32 %v4291_v50, %v3378_v52 }
  0x84   :  { %v3696_v34 = vld [vmem:[#allocation6 + $0x648] sm:$0xf]  ;;  %v3441_v40 = vor.u32 %v4311_v32, %v3440_v31  ;;  %v3826_v21 = vld [vmem:[#allocation6 + $0x768] sm:$0xf0] }
  0x85   :  { %1839 = vmatpush.bf16.msra.mxu2 %v3537_v62  ;;  %1812 = vmatpush.bf16.msra.mxu0 %v2993_v9  ;;  %v4375_v35 = vld [vmem:[#allocation6 + $0x664] sm:$0xf0]  ;;  %v3637_v62 = vor.u32 %v4355_v53, %v3634_v54  ;;  %v3093_v9 = vor.u32 %v4219_v63, %v3090_v0  ;;  %v4203_v25 = vld [vmem:[#allocation6 + $0x10c] sm:$0xf] }
  0x86   :  { %v2896_v37 = vld [vmem:[#allocation6 + $0x8] sm:$0xf]  ;;  %v3697_v44 = vor.u32 %v4375_v35, %v3696_v34  ;;  %v3026_v27 = vld [vmem:[#allocation6 + $0x128] sm:$0xf0] }
  0x87   :  { %1853 = vmatpush.bf16.msra.mxu3 %v3793_v2  ;;  %1826 = vmatpush.bf16.msra.mxu1 %v3249_v10  ;;  %v4175_v38 = vld [vmem:[#allocation6 + $0x24] sm:$0xf0]  ;;  %v3893_v2 = vor.u32 %v4419_v57, %v3890_v58  ;;  %v3349_v10 = vor.u32 %v4283_v1, %v3346_v3  ;;  %v4267_v28 = vld [vmem:[#allocation6 + $0x30c] sm:$0xf] }
  0x88   :  { %v3152_v41 = vld [vmem:[#allocation6 + $0x208] sm:$0xf]  ;;  %v2897_v51 = vor.u32 %v4175_v38, %v2896_v37  ;;  %v3282_v30 = vld [vmem:[#allocation6 + $0x328] sm:$0xf0] }
  0x89   :  { %1840 = vmatpush.bf16.msra.mxu2 %v3505_v11  ;;  %1813 = vmatpush.bf16.msra.mxu0 %v2961_v22  ;;  %v4239_v42 = vld [vmem:[#allocation6 + $0x224] sm:$0xf0]  ;;  %v3605_v11 = vor.u32 %v4347_v4, %v3602_v5  ;;  %v3061_v22 = vor.u32 %v4211_v12, %v3058_v13  ;;  %v4331_v31 = vld [vmem:[#allocation6 + $0x50c] sm:$0xf]  ;;  %v3285_v37 = vor.u32 %v4267_v28, %v3282_v30  ;;  %v3640_v28 = vld [vmem:[#allocation6 + $0x5d0] sm:$0xf] }
  0x8a   :  { %v3408_v43 = vld [vmem:[#allocation6 + $0x408] sm:$0xf]  ;;  %v3153_v55 = vor.u32 %v4239_v42, %v3152_v41  ;;  %v3538_v32 = vld [vmem:[#allocation6 + $0x528] sm:$0xf0] }
  0x8b   :  { %1854 = vmatpush.bf16.msra.mxu3 %v3761_v16  ;;  %1827 = vmatpush.bf16.msra.mxu1 %v3217_v23  ;;  %v4303_v45 = vld [vmem:[#allocation6 + $0x424] sm:$0xf0]  ;;  %v3861_v16 = vor.u32 %v4411_v6, %v3858_v7  ;;  %v3317_v23 = vor.u32 %v4275_v14, %v3314_v17  ;;  %v4395_v34 = vld [vmem:[#allocation6 + $0x70c] sm:$0xf]  ;;  %v3541_v38 = vor.u32 %v4331_v31, %v3538_v32  ;;  %v3896_v32 = vld [vmem:[#allocation6 + $0x7d0] sm:$0xf] }
  0x8c   :  { %v3664_v46 = vld [vmem:[#allocation6 + $0x608] sm:$0xf]  ;;  %v3409_v56 = vor.u32 %v4303_v45, %v3408_v43  ;;  %v3794_v35 = vld [vmem:[#allocation6 + $0x728] sm:$0xf0] }
  0x8d   :  { %1841 = vmatpush.bf16.msra.mxu2 %v3473_v24  ;;  %v4367_v47 = vld [vmem:[#allocation6 + $0x624] sm:$0xf0]  ;;  %1814 = vmatpush.bf16.msra.mxu0 %v2929_v36  ;;  %v3573_v24 = vor.u32 %v4339_v18, %v3570_v19  ;;  %v3029_v36 = vor.u32 %v4203_v25, %v3026_v27  ;;  %v4259_v41 = vld [vmem:[#allocation6 + $0x2cc] sm:$0xf]  ;;  %v3797_v42 = vor.u32 %v4395_v34, %v3794_v35  ;;  %v4296_v27 = vld [vmem:[#allocation6 + $0x3ec] sm:$0xf0] }
  0x8e   :  { %v3665_v59 = vor.u32 %v4367_v47, %v3664_v46  ;;  %v3250_v43 = vld [vmem:[#allocation6 + $0x2e8] sm:$0xf0]  ;;  %v4424_v34 = vld [vmem:[#allocation6 + $0x7ec] sm:$0xf0] }
  0x8f   :  { %1855 = vmatpush.bf16.msra.mxu3 %v3729_v29  ;;  %1828 = vmatpush.bf16.msra.mxu1 %v3185_v39  ;;  %v3829_v29 = vor.u32 %v4403_v20, %v3826_v21  ;;  %v4195_v39 = vld [vmem:[#allocation6 + $0xcc] sm:$0xf]  ;;  %v3253_v49 = vor.u32 %v4259_v41, %v3250_v43  ;;  %v3352_v41 = vld [vmem:[#allocation6 + $0x390] sm:$0xf] }
  0x90   :  { %v3506_v45 = vld [vmem:[#allocation6 + $0x4e8] sm:$0xf0]  ;;  %v4288_v43 = vld [vmem:[#allocation6 + $0x3ac] sm:$0xf0] }
  0x91   :  { %1842 = vmatpush.bf16.msra.mxu2 %v3441_v40  ;;  %1815 = vmatpush.bf16.msra.mxu0 %v2897_v51  ;;  %v2994_v40 = vld [vmem:[#allocation6 + $0xe8] sm:$0xf0] }
  0x92   :  { %v4387_v46 = vld [vmem:[#allocation6 + $0x6cc] sm:$0xf]  ;;  %v2997_v48 = vor.u32 %v4195_v39, %v2994_v40  ;;  %v3096_v39 = vld [vmem:[#allocation6 + $0x190] sm:$0xf] }
  0x93   :  { %1856 = vmatpush.bf16.msra.mxu3 %v3697_v44  ;;  %1829 = vmatpush.bf16.msra.mxu1 %v3153_v55  ;;  %v4323_v44 = vld [vmem:[#allocation6 + $0x4cc] sm:$0xf]  ;;  %v4224_v40 = vld [vmem:[#allocation6 + $0x1ac] sm:$0xf0] }
  0x94   :  { %1816 = vmatmul.bf16.vlgmr.msra.gmra.mxu0 %v4693_v26  ;;  %v3762_v47 = vld [vmem:[#allocation6 + $0x6e8] sm:$0xf0]  ;;  %v3509_v50 = vor.u32 %v4323_v44, %v3506_v45  ;;  %v3608_v44 = vld [vmem:[#allocation6 + $0x590] sm:$0xf] }
  0x95   :  { %1843 = vmatpush.bf16.msra.mxu2 %v3409_v56  ;;  %1864 = vmatpush.bf16.msrb.mxu0 %v3125_v60  ;;  %v4187_v51 = vld [vmem:[#allocation6 + $0x8c] sm:$0xf]  ;;  %v3765_v54 = vor.u32 %v4387_v46, %v3762_v47  ;;  %v4352_v45 = vld [vmem:[#allocation6 + $0x5ac] sm:$0xf0] }
  0x96   :  { %1830 = vmatmul.bf16.vlgmr.msra.gmra.mxu1 %v4695_v33  ;;  %v2962_v52 = vld [vmem:[#allocation6 + $0xa8] sm:$0xf0]  ;;  %v3864_v46 = vld [vmem:[#allocation6 + $0x790] sm:$0xf] }
  0x97   :  { %1857 = vmatpush.bf16.msra.mxu3 %v3665_v59  ;;  %1878 = vmatpush.bf16.msrb.mxu1 %v3381_v61  ;;  %v4251_v53 = vld [vmem:[#allocation6 + $0x28c] sm:$0xf]  ;;  %v2965_v60 = vor.u32 %v4187_v51, %v2962_v52  ;;  %v4416_v47 = vld [vmem:[#allocation6 + $0x7ac] sm:$0xf0] }
  0x98   :  { %1844 = vmatmul.bf16.vlgmr.msra.gmra.mxu2 %v4687_v8  ;;  %v3218_v55 = vld [vmem:[#allocation6 + $0x2a8] sm:$0xf0]  ;;  %v3064_v51 = vld [vmem:[#allocation6 + $0x150] sm:$0xf] }
  0x99   :  { %1892 = vmatpush.bf16.msrb.mxu2 %v3637_v62  ;;  %1865 = vmatpush.bf16.msrb.mxu0 %v3093_v9  ;;  %v4315_v56 = vld [vmem:[#allocation6 + $0x48c] sm:$0xf]  ;;  %v3221_v61 = vor.u32 %v4251_v53, %v3218_v55  ;;  %v4216_v52 = vld [vmem:[#allocation6 + $0x16c] sm:$0xf0] }
  0x9a   :  { %1858 = vmatmul.bf16.vlgmr.msra.gmra.mxu3 %v4689_v15  ;;  %v3474_v57 = vld [vmem:[#allocation6 + $0x4a8] sm:$0xf0]  ;;  %v3320_v53 = vld [vmem:[#allocation6 + $0x350] sm:$0xf] }
  0x9b   :  { %1906 = vmatpush.bf16.msrb.mxu3 %v3893_v2  ;;  %1879 = vmatpush.bf16.msrb.mxu1 %v3349_v10  ;;  %v4379_v58 = vld [vmem:[#allocation6 + $0x68c] sm:$0xf]  ;;  %v3477_v62 = vor.u32 %v4315_v56, %v3474_v57  ;;  %v4280_v55 = vld [vmem:[#allocation6 + $0x36c] sm:$0xf0] }
  0x9c   :  { %v3730_v59 = vld [vmem:[#allocation6 + $0x6a8] sm:$0xf0]  ;;  %v3576_v56 = vld [vmem:[#allocation6 + $0x550] sm:$0xf] }
  0x9d   :  { %1893 = vmatpush.bf16.msrb.mxu2 %v3605_v11  ;;  %1866 = vmatpush.bf16.msrb.mxu0 %v3061_v22  ;;  %v4179_v63 = vld [vmem:[#allocation6 + $0x4c] sm:$0xf]  ;;  %v3733_v2 = vor.u32 %v4379_v58, %v3730_v59  ;;  %v3128_v22 = vld [vmem:[#allocation6 + $0x1d0] sm:$0xf] }
  0x9e   :  { %v2930_v0 = vld [vmem:[#allocation6 + $0x68] sm:$0xf0]  ;;  %v4344_v57 = vld [vmem:[#allocation6 + $0x56c] sm:$0xf0] }
  0x9f   :  { %1907 = vmatpush.bf16.msrb.mxu3 %v3861_v16  ;;  %1880 = vmatpush.bf16.msrb.mxu1 %v3317_v23  ;;  %v4243_v1 = vld [vmem:[#allocation6 + $0x24c] sm:$0xf]  ;;  %v2933_v9 = vor.u32 %v4179_v63, %v2930_v0  ;;  %v4232_v23 = vld [vmem:[#allocation6 + $0x1ec] sm:$0xf0] }
  0xa0   :  { %v3186_v3 = vld [vmem:[#allocation6 + $0x268] sm:$0xf0]  ;;  %v3832_v58 = vld [vmem:[#allocation6 + $0x750] sm:$0xf] }
  0xa1   :  { %1894 = vmatpush.bf16.msrb.mxu2 %v3573_v24  ;;  %1867 = vmatpush.bf16.msrb.mxu0 %v3029_v36  ;;  %v4307_v4 = vld [vmem:[#allocation6 + $0x44c] sm:$0xf]  ;;  %v3189_v12 = vor.u32 %v4243_v1, %v3186_v3  ;;  %v3384_v24 = vld [vmem:[#allocation6 + $0x3d0] sm:$0xf]  ;;  %v3129_v36 = vor.u32 %v4232_v23, %v3128_v22 }
  0xa2   :  { %v3442_v5 = vld [vmem:[#allocation6 + $0x468] sm:$0xf0]  ;;  %v4408_v59 = vld [vmem:[#allocation6 + $0x76c] sm:$0xf0] }
  0xa3   :  { %1908 = vmatpush.bf16.msrb.mxu3 %v3829_v29  ;;  %1881 = vmatpush.bf16.msrb.mxu1 %v3285_v37  ;;  %v4371_v6 = vld [vmem:[#allocation6 + $0x64c] sm:$0xf]  ;;  %v3445_v13 = vor.u32 %v4307_v4, %v3442_v5  ;;  %v4360_v29 = vld [vmem:[#allocation6 + $0x5ec] sm:$0xf0]  ;;  %v3385_v37 = vor.u32 %v4296_v27, %v3384_v24 }
  0xa4   :  { %v3698_v7 = vld [vmem:[#allocation6 + $0x668] sm:$0xf0]  ;;  %v3032_v63 = vld [vmem:[#allocation6 + $0x110] sm:$0xf] }
  0xa5   :  { %1895 = vmatpush.bf16.msrb.mxu2 %v3541_v38  ;;  %1868 = vmatpush.bf16.msrb.mxu0 %v2997_v48  ;;  %v4171_v10 = vld [vmem:[#allocation6 + $0xc] sm:$0xf]  ;;  %v3701_v18 = vor.u32 %v4371_v6, %v3698_v7  ;;  %v3641_v38 = vor.u32 %v4360_v29, %v3640_v28  ;;  %v3097_v48 = vor.u32 %v4224_v40, %v3096_v39  ;;  %v4208_v0 = vld [vmem:[#allocation6 + $0x12c] sm:$0xf0] }
  0xa6   :  { %v2898_v11 = vld [vmem:[#allocation6 + $0x28] sm:$0xf0]  ;;  %v3288_v1 = vld [vmem:[#allocation6 + $0x310] sm:$0xf] }
  0xa7   :  { %1909 = vmatpush.bf16.msrb.mxu3 %v3797_v42  ;;  %1882 = vmatpush.bf16.msrb.mxu1 %v3253_v49  ;;  %v4235_v14 = vld [vmem:[#allocation6 + $0x20c] sm:$0xf]  ;;  %v2901_v25 = vor.u32 %v4171_v10, %v2898_v11  ;;  %v3897_v42 = vor.u32 %v4424_v34, %v3896_v32  ;;  %v3353_v49 = vor.u32 %v4288_v43, %v3352_v41  ;;  %v4272_v3 = vld [vmem:[#allocation6 + $0x32c] sm:$0xf0] }
  0xa8   :  { %v3154_v16 = vld [vmem:[#allocation6 + $0x228] sm:$0xf0]  ;;  %v3544_v4 = vld [vmem:[#allocation6 + $0x510] sm:$0xf]  ;;  %v3289_v10 = vor.u32 %v4272_v3, %v3288_v1  ;;  %v4356_v1 = vld [vmem:[#allocation6 + $0x5d4] sm:$0xf] }
  0xa9   :  { %1896 = vmatpush.bf16.msrb.mxu2 %v3509_v50  ;;  %1869 = vmatpush.bf16.msrb.mxu0 %v2965_v60  ;;  %v4299_v17 = vld [vmem:[#allocation6 + $0x40c] sm:$0xf]  ;;  %v3157_v30 = vor.u32 %v4235_v14, %v3154_v16  ;;  %v3609_v50 = vor.u32 %v4352_v45, %v3608_v44  ;;  %v3065_v60 = vor.u32 %v4216_v52, %v3064_v51  ;;  %v4336_v5 = vld [vmem:[#allocation6 + $0x52c] sm:$0xf0] }
  0xaa   :  { %v3410_v19 = vld [vmem:[#allocation6 + $0x428] sm:$0xf0]  ;;  %v3800_v6 = vld [vmem:[#allocation6 + $0x710] sm:$0xf]  ;;  %v3545_v11 = vor.u32 %v4336_v5, %v3544_v4  ;;  %v4420_v5 = vld [vmem:[#allocation6 + $0x7d4] sm:$0xf] }
  0xab   :  { %1910 = vmatpush.bf16.msrb.mxu3 %v3765_v54  ;;  %1883 = vmatpush.bf16.msrb.mxu1 %v3221_v61  ;;  %v4363_v20 = vld [vmem:[#allocation6 + $0x60c] sm:$0xf]  ;;  %v3413_v31 = vor.u32 %v4299_v17, %v3410_v19  ;;  %v3865_v54 = vor.u32 %v4416_v47, %v3864_v46  ;;  %v3321_v61 = vor.u32 %v4280_v55, %v3320_v53  ;;  %v4400_v7 = vld [vmem:[#allocation6 + $0x72c] sm:$0xf0] }
  0xac   :  { %v3666_v21 = vld [vmem:[#allocation6 + $0x628] sm:$0xf0]  ;;  %v3256_v14 = vld [vmem:[#allocation6 + $0x2d0] sm:$0xf]  ;;  %v3801_v16 = vor.u32 %v4400_v7, %v3800_v6  ;;  %v3898_v6 = vld [vmem:[#allocation6 + $0x7f0] sm:$0xf0] }
  0xad   :  { %1897 = vmatpush.bf16.msrb.mxu2 %v3477_v62  ;;  %1870 = vmatpush.bf16.msrb.mxu0 %v2933_v9  ;;  %v3669_v35 = vor.u32 %v4363_v20, %v3666_v21  ;;  %v3577_v62 = vor.u32 %v4344_v57, %v3576_v56  ;;  %v3033_v9 = vor.u32 %v4208_v0, %v3032_v63  ;;  %v4264_v17 = vld [vmem:[#allocation6 + $0x2ec] sm:$0xf0]  ;;  %v3386_v0 = vld [vmem:[#allocation6 + $0x3f0] sm:$0xf0] }
  0xae   :  { %v4328_v19 = vld [vmem:[#allocation6 + $0x4ec] sm:$0xf0]  ;;  %v3257_v23 = vor.u32 %v4264_v17, %v3256_v14  ;;  %v4284_v14 = vld [vmem:[#allocation6 + $0x394] sm:$0xf] }
  0xaf   :  { %1911 = vmatpush.bf16.msrb.mxu3 %v3733_v2  ;;  %1884 = vmatpush.bf16.msrb.mxu1 %v3189_v12  ;;  %v3833_v2 = vor.u32 %v4408_v59, %v3832_v58  ;;  %v3000_v12 = vld [vmem:[#allocation6 + $0xd0] sm:$0xf]  ;;  %v3354_v17 = vld [vmem:[#allocation6 + $0x3b0] sm:$0xf0] }
  0xb0   :  { %v3768_v20 = vld [vmem:[#allocation6 + $0x6d0] sm:$0xf] }
  0xb1   :  { %1898 = vmatpush.bf16.msrb.mxu2 %v3445_v13  ;;  %1871 = vmatpush.bf16.msrb.mxu0 %v2901_v25  ;;  %v4200_v13 = vld [vmem:[#allocation6 + $0xec] sm:$0xf0] }
  0xb2   :  { %v4392_v21 = vld [vmem:[#allocation6 + $0x6ec] sm:$0xf0]  ;;  %v3001_v22 = vor.u32 %v4200_v13, %v3000_v12  ;;  %v4220_v12 = vld [vmem:[#allocation6 + $0x194] sm:$0xf] }
  0xb3   :  { %1912 = vmatpush.bf16.msrb.mxu3 %v3701_v18  ;;  %1885 = vmatpush.bf16.msrb.mxu1 %v3157_v30  ;;  %v3512_v18 = vld [vmem:[#allocation6 + $0x4d0] sm:$0xf]  ;;  %v3769_v29 = vor.u32 %v4392_v21, %v3768_v20  ;;  %v3098_v13 = vld [vmem:[#allocation6 + $0x1b0] sm:$0xf0] }
  0xb4   :  { %1872 = vmatmul.bf16.vlgmr.msrb.gmra.mxu0 %v4693_v26  ;;  %v3513_v24 = vor.u32 %v4328_v19, %v3512_v18  ;;  %v2968_v25 = vld [vmem:[#allocation6 + $0x90] sm:$0xf]  ;;  %v4348_v18 = vld [vmem:[#allocation6 + $0x594] sm:$0xf] }
  0xb5   :  { %1899 = vmatpush.bf16.msrb.mxu2 %v3413_v31  ;;  %1920 = vmatpush.bf16.msra.mxu0 %v3129_v36  ;;  %v4192_v27 = vld [vmem:[#allocation6 + $0xac] sm:$0xf0]  ;;  %v3610_v19 = vld [vmem:[#allocation6 + $0x5b0] sm:$0xf0] }
  0xb6   :  { %1886 = vmatmul.bf16.vlgmr.msrb.gmra.mxu1 %v4695_v33  ;;  %v3224_v28 = vld [vmem:[#allocation6 + $0x290] sm:$0xf]  ;;  %v2969_v36 = vor.u32 %v4192_v27, %v2968_v25  ;;  %v4412_v20 = vld [vmem:[#allocation6 + $0x794] sm:$0xf] }
  0xb7   :  { %1913 = vmatpush.bf16.msrb.mxu3 %v3669_v35  ;;  %1934 = vmatpush.bf16.msra.mxu1 %v3385_v37  ;;  %v4256_v30 = vld [vmem:[#allocation6 + $0x2ac] sm:$0xf0]  ;;  %v3866_v21 = vld [vmem:[#allocation6 + $0x7b0] sm:$0xf0] }
  0xb8   :  { %1900 = vmatmul.bf16.vlgmr.msrb.gmra.mxu2 %v4687_v8  ;;  %v3480_v31 = vld [vmem:[#allocation6 + $0x490] sm:$0xf]  ;;  %v3225_v37 = vor.u32 %v4256_v30, %v3224_v28  ;;  %v4212_v25 = vld [vmem:[#allocation6 + $0x154] sm:$0xf] }
  0xb9   :  { %1948 = vmatpush.bf16.msra.mxu2 %v3641_v38  ;;  %1921 = vmatpush.bf16.msra.mxu0 %v3097_v48  ;;  %v4320_v32 = vld [vmem:[#allocation6 + $0x4ac] sm:$0xf0]  ;;  %v3066_v27 = vld [vmem:[#allocation6 + $0x170] sm:$0xf0] }
  0xba   :  { %1914 = vmatmul.bf16.vlgmr.msrb.gmra.mxu3 %v4689_v15  ;;  %v3736_v34 = vld [vmem:[#allocation6 + $0x690] sm:$0xf]  ;;  %v3481_v38 = vor.u32 %v4320_v32, %v3480_v31  ;;  %v4276_v28 = vld [vmem:[#allocation6 + $0x354] sm:$0xf] }
  0xbb   :  { %1962 = vmatpush.bf16.msra.mxu3 %v3897_v42  ;;  %1935 = vmatpush.bf16.msra.mxu1 %v3353_v49  ;;  %v4384_v35 = vld [vmem:[#allocation6 + $0x6ac] sm:$0xf0]  ;;  %v3322_v30 = vld [vmem:[#allocation6 + $0x370] sm:$0xf0] }
  0xbc   :  { %v2936_v39 = vld [vmem:[#allocation6 + $0x50] sm:$0xf]  ;;  %v3737_v42 = vor.u32 %v4384_v35, %v3736_v34  ;;  %v4340_v31 = vld [vmem:[#allocation6 + $0x554] sm:$0xf] }
  0xbd   :  { %1949 = vmatpush.bf16.msra.mxu2 %v3609_v50  ;;  %1922 = vmatpush.bf16.msra.mxu0 %v3065_v60  ;;  %v4184_v40 = vld [vmem:[#allocation6 + $0x6c] sm:$0xf0]  ;;  %v4228_v60 = vld [vmem:[#allocation6 + $0x1d4] sm:$0xf] }
  0xbe   :  { %v3192_v41 = vld [vmem:[#allocation6 + $0x250] sm:$0xf]  ;;  %v2937_v48 = vor.u32 %v4184_v40, %v2936_v39  ;;  %v3578_v32 = vld [vmem:[#allocation6 + $0x570] sm:$0xf0] }
  0xbf   :  { %1963 = vmatpush.bf16.msra.mxu3 %v3865_v54  ;;  %1936 = vmatpush.bf16.msra.mxu1 %v3321_v61  ;;  %v4248_v43 = vld [vmem:[#allocation6 + $0x26c] sm:$0xf0]  ;;  %v3130_v61 = vld [vmem:[#allocation6 + $0x1f0] sm:$0xf0] }
  0xc0   :  { %v3448_v44 = vld [vmem:[#allocation6 + $0x450] sm:$0xf]  ;;  %v3193_v51 = vor.u32 %v4248_v43, %v3192_v41  ;;  %v4404_v34 = vld [vmem:[#allocation6 + $0x754] sm:$0xf] }
  0xc1   :  { %1950 = vmatpush.bf16.msra.mxu2 %v3577_v62  ;;  %1923 = vmatpush.bf16.msra.mxu0 %v3033_v9  ;;  %v4312_v45 = vld [vmem:[#allocation6 + $0x46c] sm:$0xf0]  ;;  %v4292_v62 = vld [vmem:[#allocation6 + $0x3d4] sm:$0xf]  ;;  %v3133_v9 = vor.u32 %v4228_v60, %v3130_v61 }
  0xc2   :  { %v3704_v46 = vld [vmem:[#allocation6 + $0x650] sm:$0xf]  ;;  %v3449_v52 = vor.u32 %v4312_v45, %v3448_v44  ;;  %v3834_v35 = vld [vmem:[#allocation6 + $0x770] sm:$0xf0] }
  0xc3   :  { %1964 = vmatpush.bf16.msra.mxu3 %v3833_v2  ;;  %1937 = vmatpush.bf16.msra.mxu1 %v3289_v10  ;;  %v4376_v47 = vld [vmem:[#allocation6 + $0x66c] sm:$0xf0]  ;;  %v3642_v2 = vld [vmem:[#allocation6 + $0x5f0] sm:$0xf0]  ;;  %v3389_v10 = vor.u32 %v4292_v62, %v3386_v0 }
  0xc4   :  { %v2904_v49 = vld [vmem:[#allocation6 + $0x10] sm:$0xf]  ;;  %v3705_v56 = vor.u32 %v4376_v47, %v3704_v46  ;;  %v4204_v39 = vld [vmem:[#allocation6 + $0x114] sm:$0xf] }
  0xc5   :  { %1951 = vmatpush.bf16.msra.mxu2 %v3545_v11  ;;  %1924 = vmatpush.bf16.msra.mxu0 %v3001_v22  ;;  %v4176_v50 = vld [vmem:[#allocation6 + $0x2c] sm:$0xf0]  ;;  %v3645_v11 = vor.u32 %v4356_v1, %v3642_v2  ;;  %v3101_v22 = vor.u32 %v4220_v12, %v3098_v13  ;;  %v3034_v40 = vld [vmem:[#allocation6 + $0x130] sm:$0xf0] }
  0xc6   :  { %v3160_v53 = vld [vmem:[#allocation6 + $0x210] sm:$0xf]  ;;  %v2905_v63 = vor.u32 %v4176_v50, %v2904_v49  ;;  %v4268_v41 = vld [vmem:[#allocation6 + $0x314] sm:$0xf] }
  0xc7   :  { %1965 = vmatpush.bf16.msra.mxu3 %v3801_v16  ;;  %1938 = vmatpush.bf16.msra.mxu1 %v3257_v23  ;;  %v4240_v54 = vld [vmem:[#allocation6 + $0x22c] sm:$0xf0]  ;;  %v3901_v16 = vor.u32 %v4420_v5, %v3898_v6  ;;  %v3357_v23 = vor.u32 %v4284_v14, %v3354_v17  ;;  %v3290_v43 = vld [vmem:[#allocation6 + $0x330] sm:$0xf0] }
  0xc8   :  { %v3416_v55 = vld [vmem:[#allocation6 + $0x410] sm:$0xf]  ;;  %v3161_v3 = vor.u32 %v4240_v54, %v3160_v53  ;;  %v4332_v44 = vld [vmem:[#allocation6 + $0x514] sm:$0xf]  ;;  %v3293_v49 = vor.u32 %v4268_v41, %v3290_v43  ;;  %v3648_v41 = vld [vmem:[#allocation6 + $0x5d8] sm:$0xf] }
  0xc9   :  { %1952 = vmatpush.bf16.msra.mxu2 %v3513_v24  ;;  %1925 = vmatpush.bf16.msra.mxu0 %v2969_v36  ;;  %v4304_v57 = vld [vmem:[#allocation6 + $0x42c] sm:$0xf0]  ;;  %v3613_v24 = vor.u32 %v4348_v18, %v3610_v19  ;;  %v3069_v36 = vor.u32 %v4212_v25, %v3066_v27  ;;  %v3546_v45 = vld [vmem:[#allocation6 + $0x530] sm:$0xf0] }
  0xca   :  { %v3672_v58 = vld [vmem:[#allocation6 + $0x610] sm:$0xf]  ;;  %v3417_v4 = vor.u32 %v4304_v57, %v3416_v55  ;;  %v4396_v46 = vld [vmem:[#allocation6 + $0x714] sm:$0xf]  ;;  %v3549_v50 = vor.u32 %v4332_v44, %v3546_v45  ;;  %v3904_v45 = vld [vmem:[#allocation6 + $0x7d8] sm:$0xf] }
  0xcb   :  { %1966 = vmatpush.bf16.msra.mxu3 %v3769_v29  ;;  %1939 = vmatpush.bf16.msra.mxu1 %v3225_v37  ;;  %v4368_v59 = vld [vmem:[#allocation6 + $0x62c] sm:$0xf0]  ;;  %v3869_v29 = vor.u32 %v4412_v20, %v3866_v21  ;;  %v3325_v37 = vor.u32 %v4276_v28, %v3322_v30  ;;  %v3802_v47 = vld [vmem:[#allocation6 + $0x730] sm:$0xf0] }
  0xcc   :  { %v3673_v7 = vor.u32 %v4368_v59, %v3672_v58  ;;  %v4260_v53 = vld [vmem:[#allocation6 + $0x2d4] sm:$0xf]  ;;  %v3805_v54 = vor.u32 %v4396_v46, %v3802_v47  ;;  %v4425_v46 = vld [vmem:[#allocation6 + $0x7f4] sm:$0xf0] }
  0xcd   :  { %1953 = vmatpush.bf16.msra.mxu2 %v3481_v38  ;;  %1926 = vmatpush.bf16.msra.mxu0 %v2937_v48  ;;  %v3581_v38 = vor.u32 %v4340_v31, %v3578_v32  ;;  %v3037_v48 = vor.u32 %v4204_v39, %v3034_v40  ;;  %v3258_v55 = vld [vmem:[#allocation6 + $0x2f0] sm:$0xf0]  ;;  %v4297_v40 = vld [vmem:[#allocation6 + $0x3f4] sm:$0xf0] }
  0xce   :  { %v3514_v57 = vld [vmem:[#allocation6 + $0x4f0] sm:$0xf0]  ;;  %v3261_v61 = vor.u32 %v4260_v53, %v3258_v55  ;;  %v3360_v53 = vld [vmem:[#allocation6 + $0x398] sm:$0xf] }
  0xcf   :  { %1967 = vmatpush.bf16.msra.mxu3 %v3737_v42  ;;  %1940 = vmatpush.bf16.msra.mxu1 %v3193_v51  ;;  %v3837_v42 = vor.u32 %v4404_v34, %v3834_v35  ;;  %v4196_v51 = vld [vmem:[#allocation6 + $0xd4] sm:$0xf]  ;;  %v4289_v55 = vld [vmem:[#allocation6 + $0x3b4] sm:$0xf0] }
  0xd0   :  { %v4388_v58 = vld [vmem:[#allocation6 + $0x6d4] sm:$0xf] }
  0xd1   :  { %1954 = vmatpush.bf16.msra.mxu2 %v3449_v52  ;;  %1927 = vmatpush.bf16.msra.mxu0 %v2905_v63  ;;  %v3002_v52 = vld [vmem:[#allocation6 + $0xf0] sm:$0xf0] }
  0xd2   :  { %v3770_v59 = vld [vmem:[#allocation6 + $0x6f0] sm:$0xf0]  ;;  %v3005_v60 = vor.u32 %v4196_v51, %v3002_v52  ;;  %v3104_v51 = vld [vmem:[#allocation6 + $0x198] sm:$0xf] }
  0xd3   :  { %1968 = vmatpush.bf16.msra.mxu3 %v3705_v56  ;;  %1941 = vmatpush.bf16.msra.mxu1 %v3161_v3  ;;  %v4324_v56 = vld [vmem:[#allocation6 + $0x4d4] sm:$0xf]  ;;  %v3773_v2 = vor.u32 %v4388_v58, %v3770_v59  ;;  %v4225_v52 = vld [vmem:[#allocation6 + $0x1b4] sm:$0xf0] }
  0xd4   :  { %1928 = vmatmul.bf16.vlgmr.msra.gmra.mxu0 %v4693_v26  ;;  %v3517_v62 = vor.u32 %v4324_v56, %v3514_v57  ;;  %v4188_v63 = vld [vmem:[#allocation6 + $0x94] sm:$0xf]  ;;  %v3616_v56 = vld [vmem:[#allocation6 + $0x598] sm:$0xf] }
  0xd5   :  { %1955 = vmatpush.bf16.msra.mxu2 %v3417_v4  ;;  %1976 = vmatpush.bf16.msrb.mxu0 %v3133_v9  ;;  %v2970_v0 = vld [vmem:[#allocation6 + $0xb0] sm:$0xf0]  ;;  %v4353_v57 = vld [vmem:[#allocation6 + $0x5b4] sm:$0xf0] }
  0xd6   :  { %1942 = vmatmul.bf16.vlgmr.msra.gmra.mxu1 %v4695_v33  ;;  %v4252_v1 = vld [vmem:[#allocation6 + $0x294] sm:$0xf]  ;;  %v2973_v9 = vor.u32 %v4188_v63, %v2970_v0  ;;  %v3872_v58 = vld [vmem:[#allocation6 + $0x798] sm:$0xf] }
  0xd7   :  { %1969 = vmatpush.bf16.msra.mxu3 %v3673_v7  ;;  %1990 = vmatpush.bf16.msrb.mxu1 %v3389_v10  ;;  %v3226_v3 = vld [vmem:[#allocation6 + $0x2b0] sm:$0xf0]  ;;  %v4417_v59 = vld [vmem:[#allocation6 + $0x7b4] sm:$0xf0] }
  0xd8   :  { %1956 = vmatmul.bf16.vlgmr.msra.gmra.mxu2 %v4687_v8  ;;  %v4316_v4 = vld [vmem:[#allocation6 + $0x494] sm:$0xf]  ;;  %v3229_v10 = vor.u32 %v4252_v1, %v3226_v3  ;;  %v3072_v63 = vld [vmem:[#allocation6 + $0x158] sm:$0xf] }
  0xd9   :  { %2004 = vmatpush.bf16.msrb.mxu2 %v3645_v11  ;;  %1977 = vmatpush.bf16.msrb.mxu0 %v3101_v22  ;;  %v3482_v5 = vld [vmem:[#allocation6 + $0x4b0] sm:$0xf0]  ;;  %v4217_v0 = vld [vmem:[#allocation6 + $0x174] sm:$0xf0] }
  0xda   :  { %1970 = vmatmul.bf16.vlgmr.msra.gmra.mxu3 %v4689_v15  ;;  %v4380_v6 = vld [vmem:[#allocation6 + $0x694] sm:$0xf]  ;;  %v3485_v11 = vor.u32 %v4316_v4, %v3482_v5  ;;  %v3328_v1 = vld [vmem:[#allocation6 + $0x358] sm:$0xf] }
  0xdb   :  { %2018 = vmatpush.bf16.msrb.mxu3 %v3901_v16  ;;  %1991 = vmatpush.bf16.msrb.mxu1 %v3357_v23  ;;  %v3738_v7 = vld [vmem:[#allocation6 + $0x6b0] sm:$0xf0]  ;;  %v4281_v3 = vld [vmem:[#allocation6 + $0x374] sm:$0xf0] }
  0xdc   :  { %v4180_v12 = vld [vmem:[#allocation6 + $0x54] sm:$0xf]  ;;  %v3741_v16 = vor.u32 %v4380_v6, %v3738_v7  ;;  %v3584_v4 = vld [vmem:[#allocation6 + $0x558] sm:$0xf] }
  0xdd   :  { %2005 = vmatpush.bf16.msrb.mxu2 %v3613_v24  ;;  %1978 = vmatpush.bf16.msrb.mxu0 %v3069_v36  ;;  %v2938_v13 = vld [vmem:[#allocation6 + $0x70] sm:$0xf0]  ;;  %v3136_v36 = vld [vmem:[#allocation6 + $0x1d8] sm:$0xf] }
  0xde   :  { %v4244_v14 = vld [vmem:[#allocation6 + $0x254] sm:$0xf]  ;;  %v2941_v22 = vor.u32 %v4180_v12, %v2938_v13  ;;  %v4345_v5 = vld [vmem:[#allocation6 + $0x574] sm:$0xf0] }
  0xdf   :  { %2019 = vmatpush.bf16.msrb.mxu3 %v3869_v29  ;;  %1992 = vmatpush.bf16.msrb.mxu1 %v3325_v37  ;;  %v3194_v17 = vld [vmem:[#allocation6 + $0x270] sm:$0xf0]  ;;  %v4233_v37 = vld [vmem:[#allocation6 + $0x1f4] sm:$0xf0] }
  0xe0   :  { %v4308_v18 = vld [vmem:[#allocation6 + $0x454] sm:$0xf]  ;;  %v3197_v25 = vor.u32 %v4244_v14, %v3194_v17  ;;  %v3840_v6 = vld [vmem:[#allocation6 + $0x758] sm:$0xf] }
  0xe1   :  { %2006 = vmatpush.bf16.msrb.mxu2 %v3581_v38  ;;  %1979 = vmatpush.bf16.msrb.mxu0 %v3037_v48  ;;  %v3450_v19 = vld [vmem:[#allocation6 + $0x470] sm:$0xf0]  ;;  %v3392_v38 = vld [vmem:[#allocation6 + $0x3d8] sm:$0xf]  ;;  %v3137_v48 = vor.u32 %v4233_v37, %v3136_v36  ;;  %v4719_v36 = vpop.f32.mrf.mxu0 }
  0xe2   :  { %v4372_v20 = vld [vmem:[#allocation6 + $0x654] sm:$0xf]  ;;  %v3453_v27 = vor.u32 %v4308_v18, %v3450_v19  ;;  %v4409_v7 = vld [vmem:[#allocation6 + $0x774] sm:$0xf0] }
  0xe3   :  { %2020 = vmatpush.bf16.msrb.mxu3 %v3837_v42  ;;  %1993 = vmatpush.bf16.msrb.mxu1 %v3293_v49  ;;  %v3706_v21 = vld [vmem:[#allocation6 + $0x670] sm:$0xf0]  ;;  %v4361_v42 = vld [vmem:[#allocation6 + $0x5f4] sm:$0xf0]  ;;  %v3393_v49 = vor.u32 %v4297_v40, %v3392_v38  ;;  %v4721_v38 = vpop.f32.mrf.mxu1 }
  0xe4   :  { %v4172_v23 = vld [vmem:[#allocation6 + $0x14] sm:$0xf]  ;;  %v3709_v31 = vor.u32 %v4372_v20, %v3706_v21  ;;  %v3040_v12 = vld [vmem:[#allocation6 + $0x118] sm:$0xf] }
  0xe5   :  { %2007 = vmatpush.bf16.msrb.mxu2 %v3549_v50  ;;  %1980 = vmatpush.bf16.msrb.mxu0 %v3005_v60  ;;  %v2906_v24 = vld [vmem:[#allocation6 + $0x30] sm:$0xf0]  ;;  %v3649_v50 = vor.u32 %v4361_v42, %v3648_v41  ;;  %v3105_v60 = vor.u32 %v4225_v52, %v3104_v51  ;;  %v4209_v13 = vld [vmem:[#allocation6 + $0x134] sm:$0xf0]  ;;  %v4723_v51 = vpop.f32.mrf.mxu2 }
  0xe6   :  { %v4236_v28 = vld [vmem:[#allocation6 + $0x214] sm:$0xf]  ;;  %v2909_v39 = vor.u32 %v4172_v23, %v2906_v24  ;;  %v3296_v14 = vld [vmem:[#allocation6 + $0x318] sm:$0xf] }
  0xe7   :  { %2021 = vmatpush.bf16.msrb.mxu3 %v3805_v54  ;;  %1994 = vmatpush.bf16.msrb.mxu1 %v3261_v61  ;;  %v3162_v29 = vld [vmem:[#allocation6 + $0x230] sm:$0xf0]  ;;  %v3905_v54 = vor.u32 %v4425_v46, %v3904_v45  ;;  %v3361_v61 = vor.u32 %v4289_v55, %v3360_v53  ;;  %v4273_v17 = vld [vmem:[#allocation6 + $0x334] sm:$0xf0] }
  0xe8   :  { %v4300_v30 = vld [vmem:[#allocation6 + $0x414] sm:$0xf]  ;;  %v3165_v43 = vor.u32 %v4236_v28, %v3162_v29  ;;  %v3552_v18 = vld [vmem:[#allocation6 + $0x518] sm:$0xf]  ;;  %v3297_v23 = vor.u32 %v4273_v17, %v3296_v14  ;;  %v3138_v17 = vld [vmem:[#allocation6 + $0x1f8] sm:$0xf0] }
  0xe9   :  { %2008 = vmatpush.bf16.msrb.mxu2 %v3517_v62  ;;  %1981 = vmatpush.bf16.msrb.mxu0 %v2973_v9  ;;  %v3418_v32 = vld [vmem:[#allocation6 + $0x430] sm:$0xf0]  ;;  %v3617_v62 = vor.u32 %v4353_v57, %v3616_v56  ;;  %v3073_v9 = vor.u32 %v4217_v0, %v3072_v63  ;;  %v4337_v19 = vld [vmem:[#allocation6 + $0x534] sm:$0xf0]  ;;  %v4725_v57 = vpop.f32.mrf.mxu3 }
  0xea   :  { %v4364_v34 = vld [vmem:[#allocation6 + $0x614] sm:$0xf]  ;;  %v3421_v44 = vor.u32 %v4300_v30, %v3418_v32  ;;  %v3808_v20 = vld [vmem:[#allocation6 + $0x718] sm:$0xf]  ;;  %v3553_v24 = vor.u32 %v4337_v19, %v3552_v18  ;;  %v4293_v18 = vld [vmem:[#allocation6 + $0x3dc] sm:$0xf] }
  0xeb   :  { %2022 = vmatpush.bf16.msrb.mxu3 %v3773_v2  ;;  %1995 = vmatpush.bf16.msrb.mxu1 %v3229_v10  ;;  %v3674_v35 = vld [vmem:[#allocation6 + $0x630] sm:$0xf0]  ;;  %v3873_v2 = vor.u32 %v4417_v59, %v3872_v58  ;;  %v3329_v10 = vor.u32 %v4281_v3, %v3328_v1  ;;  %v4401_v21 = vld [vmem:[#allocation6 + $0x734] sm:$0xf0]  ;;  %v4729_v14 = vpop.f32.mrf.mxu1 }
  0xec   :  { %v3677_v47 = vor.u32 %v4364_v34, %v3674_v35  ;;  %v3264_v28 = vld [vmem:[#allocation6 + $0x2d8] sm:$0xf]  ;;  %v3809_v29 = vor.u32 %v4401_v21, %v3808_v20  ;;  %v3394_v20 = vld [vmem:[#allocation6 + $0x3f8] sm:$0xf0] }
  0xed   :  { %2009 = vmatpush.bf16.msrb.mxu2 %v3485_v11  ;;  %1982 = vmatpush.bf16.msrb.mxu0 %v2941_v22  ;;  %v3585_v11 = vor.u32 %v4345_v5, %v3584_v4  ;;  %v3041_v22 = vor.u32 %v4209_v13, %v3040_v12  ;;  %v4265_v30 = vld [vmem:[#allocation6 + $0x2f4] sm:$0xf0]  ;;  %v4357_v21 = vld [vmem:[#allocation6 + $0x5dc] sm:$0xf] }
  0xee   :  { %v4329_v32 = vld [vmem:[#allocation6 + $0x4f4] sm:$0xf0] }
  0xef   :  { %2023 = vmatpush.bf16.msrb.mxu3 %v3741_v16  ;;  %1996 = vmatpush.bf16.msrb.mxu1 %v3197_v25  ;;  %v3841_v16 = vor.u32 %v4409_v7, %v3840_v6  ;;  %v3008_v25 = vld [vmem:[#allocation6 + $0xd8] sm:$0xf] }
  0xf0   :  { %v3776_v34 = vld [vmem:[#allocation6 + $0x6d8] sm:$0xf] }
  0xf1   :  { %2010 = vmatpush.bf16.msrb.mxu2 %v3453_v27  ;;  %1983 = vmatpush.bf16.msrb.mxu0 %v2909_v39  ;;  %v4201_v27 = vld [vmem:[#allocation6 + $0xf4] sm:$0xf0]  ;;  %v3265_v39 = vor.u32 %v4265_v30, %v3264_v28  ;;  %v4731_v30 = vpop.f32.mrf.mxu2 }
  0xf2   :  { %v4393_v35 = vld [vmem:[#allocation6 + $0x6f4] sm:$0xf0]  ;;  %v3009_v37 = vor.u32 %v4201_v27, %v3008_v25  ;;  %v4421_v25 = vld [vmem:[#allocation6 + $0x7dc] sm:$0xf] }
  0xf3   :  { %2024 = vmatpush.bf16.msrb.mxu3 %v3709_v31  ;;  %1997 = vmatpush.bf16.msrb.mxu1 %v3165_v43  ;;  %v3520_v31 = vld [vmem:[#allocation6 + $0x4d8] sm:$0xf]  ;;  %v3906_v27 = vld [vmem:[#allocation6 + $0x7f8] sm:$0xf0] }
  0xf4   :  { %1984 = vmatmul.bf16.vlgmr.msrb.gmra.mxu0 %v4693_v26  ;;  %v3521_v40 = vor.u32 %v4329_v32, %v3520_v31  ;;  %v2976_v41 = vld [vmem:[#allocation6 + $0x98] sm:$0xf]  ;;  %v3397_v31 = vor.u32 %v4293_v18, %v3394_v20  ;;  %v3010_v20 = vld [vmem:[#allocation6 + $0xf8] sm:$0xf0] }
  0xf5   :  { %2011 = vmatpush.bf16.msrb.mxu2 %v3421_v44  ;;  %2032 = vmatpush.bf16.msra.mxu0 %v3137_v48  ;;  %v4193_v42 = vld [vmem:[#allocation6 + $0xb4] sm:$0xf0]  ;;  %v3777_v44 = vor.u32 %v4393_v35, %v3776_v34  ;;  %v4221_v34 = vld [vmem:[#allocation6 + $0x19c] sm:$0xf] }
  0xf6   :  { %1998 = vmatmul.bf16.vlgmr.msrb.gmra.mxu1 %v4695_v33  ;;  %v3232_v43 = vld [vmem:[#allocation6 + $0x298] sm:$0xf]  ;;  %v3106_v35 = vld [vmem:[#allocation6 + $0x1b8] sm:$0xf0] }
  0xf7   :  { %2025 = vmatpush.bf16.msrb.mxu3 %v3677_v47  ;;  %2046 = vmatpush.bf16.msra.mxu1 %v3393_v49  ;;  %v4257_v45 = vld [vmem:[#allocation6 + $0x2b4] sm:$0xf0] }
  0xf8   :  { %2012 = vmatmul.bf16.vlgmr.msrb.gmra.mxu2 %v4687_v8  ;;  %v3488_v46 = vld [vmem:[#allocation6 + $0x498] sm:$0xf]  ;;  %v3233_v52 = vor.u32 %v4257_v45, %v3232_v43  ;;  %v3618_v43 = vld [vmem:[#allocation6 + $0x5b8] sm:$0xf0] }
  0xf9   :  { %2060 = vmatpush.bf16.msra.mxu2 %v3649_v50  ;;  %2033 = vmatpush.bf16.msra.mxu0 %v3105_v60  ;;  %v4321_v47 = vld [vmem:[#allocation6 + $0x4b4] sm:$0xf0]  ;;  %v2977_v50 = vor.u32 %v4193_v42, %v2976_v41  ;;  %v3362_v41 = vld [vmem:[#allocation6 + $0x3b8] sm:$0xf0] }
  0xfa   :  { %2026 = vmatmul.bf16.vlgmr.msrb.gmra.mxu3 %v4689_v15  ;;  %v3744_v48 = vld [vmem:[#allocation6 + $0x698] sm:$0xf]  ;;  %v3489_v53 = vor.u32 %v4321_v47, %v3488_v46  ;;  %v4349_v42 = vld [vmem:[#allocation6 + $0x59c] sm:$0xf]  ;;  %v3109_v46 = vor.u32 %v4221_v34, %v3106_v35 }
  0xfb   :  { %2074 = vmatpush.bf16.msra.mxu3 %v3905_v54  ;;  %2047 = vmatpush.bf16.msra.mxu1 %v3361_v61  ;;  %v4385_v49 = vld [vmem:[#allocation6 + $0x6b4] sm:$0xf0]  ;;  %v3874_v45 = vld [vmem:[#allocation6 + $0x7b8] sm:$0xf0] }
  0xfc   :  { %v2944_v54 = vld [vmem:[#allocation6 + $0x58] sm:$0xf]  ;;  %v3745_v58 = vor.u32 %v4385_v49, %v3744_v48  ;;  %v3621_v49 = vor.u32 %v4349_v42, %v3618_v43  ;;  %v3234_v43 = vld [vmem:[#allocation6 + $0x2b8] sm:$0xf0] }
  0xfd   :  { %2061 = vmatpush.bf16.msra.mxu2 %v3617_v62  ;;  %2034 = vmatpush.bf16.msra.mxu0 %v3073_v9  ;;  %v4185_v55 = vld [vmem:[#allocation6 + $0x74] sm:$0xf0]  ;;  %v4727_v9 = vpop.f32.mrf.mxu0 }
  0xfe   :  { %v3200_v56 = vld [vmem:[#allocation6 + $0x258] sm:$0xf]  ;;  %v2945_v0 = vor.u32 %v4185_v55, %v2944_v54  ;;  %v4277_v54 = vld [vmem:[#allocation6 + $0x35c] sm:$0xf] }
  0xff   :  { %2075 = vmatpush.bf16.msra.mxu3 %v3873_v2  ;;  %2048 = vmatpush.bf16.msra.mxu1 %v3329_v10  ;;  %v4249_v59 = vld [vmem:[#allocation6 + $0x274] sm:$0xf0] }
 0x100   :  { %v3456_v60 = vld [vmem:[#allocation6 + $0x458] sm:$0xf]  ;;  %v3201_v3 = vor.u32 %v4249_v59, %v3200_v56  ;;  %v3330_v56 = vld [vmem:[#allocation6 + $0x378] sm:$0xf0] }
 0x101   :  { %2062 = vmatpush.bf16.msra.mxu2 %v3585_v11  ;;  %2035 = vmatpush.bf16.msra.mxu0 %v3041_v22  ;;  %v4313_v61 = vld [vmem:[#allocation6 + $0x474] sm:$0xf0]  ;;  %v3650_v22 = vld [vmem:[#allocation6 + $0x5f8] sm:$0xf0] }
 0x102   :  { %v3712_v62 = vld [vmem:[#allocation6 + $0x658] sm:$0xf]  ;;  %v3457_v4 = vor.u32 %v4313_v61, %v3456_v60  ;;  %v3653_v32 = vor.u32 %v4357_v21, %v3650_v22  ;;  %v3586_v59 = vld [vmem:[#allocation6 + $0x578] sm:$0xf0] }
 0x103   :  { %2076 = vmatpush.bf16.msra.mxu3 %v3841_v16  ;;  %2049 = vmatpush.bf16.msra.mxu1 %v3297_v23  ;;  %v4377_v63 = vld [vmem:[#allocation6 + $0x674] sm:$0xf0]  ;;  %v4229_v16 = vld [vmem:[#allocation6 + $0x1dc] sm:$0xf] }
 0x104   :  { %v2912_v1 = vld [vmem:[#allocation6 + $0x18] sm:$0xf]  ;;  %v3713_v10 = vor.u32 %v4377_v63, %v3712_v62  ;;  %v4405_v60 = vld [vmem:[#allocation6 + $0x75c] sm:$0xf]  ;;  %v4743_v63 = vpop.f32.mrf.mxu2 }
 0x105   :  { %2063 = vmatpush.bf16.msra.mxu2 %v3553_v24  ;;  %2036 = vmatpush.bf16.msra.mxu0 %v3009_v37  ;;  %v4177_v2 = vld [vmem:[#allocation6 + $0x34] sm:$0xf0]  ;;  %v4285_v37 = vld [vmem:[#allocation6 + $0x39c] sm:$0xf]  ;;  %v4735_v47 = vpop.f32.mrf.mxu0 }
 0x106   :  { %v3168_v5 = vld [vmem:[#allocation6 + $0x218] sm:$0xf]  ;;  %v2913_v19 = vor.u32 %v4177_v2, %v2912_v1  ;;  %v3365_v48 = vor.u32 %v4285_v37, %v3362_v41  ;;  %v3842_v61 = vld [vmem:[#allocation6 + $0x778] sm:$0xf0] }
 0x107   :  { %2077 = vmatpush.bf16.msra.mxu3 %v3809_v29  ;;  %2050 = vmatpush.bf16.msra.mxu1 %v3265_v39  ;;  %v4241_v6 = vld [vmem:[#allocation6 + $0x234] sm:$0xf0]  ;;  %v3141_v29 = vor.u32 %v4229_v16, %v3138_v17  ;;  %v4733_v39 = vpop.f32.mrf.mxu3  ;;  %v4205_v2 = vld [vmem:[#allocation6 + $0x11c] sm:$0xf] }
 0x108   :  { %v3424_v7 = vld [vmem:[#allocation6 + $0x418] sm:$0xf]  ;;  %v3169_v23 = vor.u32 %v4241_v6, %v3168_v5  ;;  %v3845_v5 = vor.u32 %v4405_v60, %v3842_v61  ;;  %v4261_v21 = vld [vmem:[#allocation6 + $0x2dc] sm:$0xf] }
 0x109   :  { %2064 = vmatpush.bf16.msra.mxu2 %v3521_v40  ;;  %2037 = vmatpush.bf16.msra.mxu0 %v2977_v50  ;;  %v4305_v11 = vld [vmem:[#allocation6 + $0x434] sm:$0xf0]  ;;  %v3909_v40 = vor.u32 %v4421_v25, %v3906_v27  ;;  %v4737_v50 = vpop.f32.mrf.mxu1  ;;  %v4325_v25 = vld [vmem:[#allocation6 + $0x4dc] sm:$0xf] }
 0x10a   :  { %v3680_v12 = vld [vmem:[#allocation6 + $0x618] sm:$0xf]  ;;  %v3425_v24 = vor.u32 %v4305_v11, %v3424_v7  ;;  %v3298_v7 = vld [vmem:[#allocation6 + $0x338] sm:$0xf0] }
 0x10b   :  { %2078 = vmatpush.bf16.msra.mxu3 %v3777_v44  ;;  %2051 = vmatpush.bf16.msra.mxu1 %v3233_v52  ;;  %v4369_v13 = vld [vmem:[#allocation6 + $0x634] sm:$0xf0]  ;;  %v4413_v44 = vld [vmem:[#allocation6 + $0x79c] sm:$0xf] }
 0x10c   :  { %v3681_v28 = vor.u32 %v4369_v13, %v3680_v12  ;;  %v4213_v52 = vld [vmem:[#allocation6 + $0x15c] sm:$0xf]  ;;  %v3877_v55 = vor.u32 %v4413_v44, %v3874_v45 }
 0x10d   :  { %2065 = vmatpush.bf16.msra.mxu2 %v3489_v53  ;;  %2038 = vmatpush.bf16.msra.mxu0 %v2945_v0  ;;  %v3074_v53 = vld [vmem:[#allocation6 + $0x178] sm:$0xf0]  ;;  %v3333_v0 = vor.u32 %v4277_v54, %v3330_v56 }
 0x10e   :  { %v3077_v62 = vor.u32 %v4213_v52, %v3074_v53  ;;  %v3554_v11 = vld [vmem:[#allocation6 + $0x538] sm:$0xf0] }
 0x10f   :  { %2079 = vmatpush.bf16.msra.mxu3 %v3745_v58  ;;  %2052 = vmatpush.bf16.msra.mxu1 %v3201_v3  ;;  %v4341_v58 = vld [vmem:[#allocation6 + $0x55c] sm:$0xf]  ;;  %v4745_v6 = vpop.f32.mrf.mxu3 }
 0x110   :  { %v3589_v1 = vor.u32 %v4341_v58, %v3586_v59  ;;  %v3042_v3 = vld [vmem:[#allocation6 + $0x138] sm:$0xf0] }
 0x111   :  { %2066 = vmatpush.bf16.msra.mxu2 %v3457_v4  ;;  %2039 = vmatpush.bf16.msra.mxu0 %v2913_v19  ;;  %v4269_v4 = vld [vmem:[#allocation6 + $0x31c] sm:$0xf]  ;;  %v3045_v16 = vor.u32 %v4205_v2, %v3042_v3 }
 0x112   :  { %v4397_v12 = vld [vmem:[#allocation6 + $0x71c] sm:$0xf]  ;;  %v3301_v17 = vor.u32 %v4269_v4, %v3298_v7 }
 0x113   :  { %2080 = vmatpush.bf16.msra.mxu3 %v3713_v10  ;;  %2053 = vmatpush.bf16.msra.mxu1 %v3169_v23  ;;  %v4333_v10 = vld [vmem:[#allocation6 + $0x51c] sm:$0xf]  ;;  %v4747_v23 = vpop.f32.mrf.mxu0 }
 0x114   :  { %2040 = vmatmul.bf16.vlgmr.msra.gmra.mxu0 %v4693_v26  ;;  %v3810_v13 = vld [vmem:[#allocation6 + $0x738] sm:$0xf0]  ;;  %v3557_v18 = vor.u32 %v4333_v10, %v3554_v11 }
 0x115   :  { %2067 = vmatpush.bf16.msra.mxu2 %v3425_v24  ;;  %2088 = vmatpush.bf16.msrb.mxu0 %v3141_v29  ;;  %v4197_v19 = vld [vmem:[#allocation6 + $0xdc] sm:$0xf]  ;;  %v3813_v22 = vor.u32 %v4397_v12, %v3810_v13 }
 0x116   :  { %2054 = vmatmul.bf16.vlgmr.msra.gmra.mxu1 %v4695_v33  ;;  %v3266_v24 = vld [vmem:[#allocation6 + $0x2f8] sm:$0xf0] }
 0x117   :  { %2081 = vmatpush.bf16.msra.mxu3 %v3681_v28  ;;  %2102 = vmatpush.bf16.msrb.mxu1 %v3397_v31  ;;  %v3522_v27 = vld [vmem:[#allocation6 + $0x4f8] sm:$0xf0]  ;;  %v4749_v28 = vpop.f32.mrf.mxu1  ;;  %v3269_v34 = vor.u32 %v4261_v21, %v3266_v24  ;;  %v4753_v52 = vpop.f32.mrf.mxu3 }
 0x118   :  { %2068 = vmatmul.bf16.vlgmr.msra.gmra.mxu2 %v4687_v8  ;;  %v4389_v29 = vld [vmem:[#allocation6 + $0x6dc] sm:$0xf]  ;;  %v3525_v35 = vor.u32 %v4325_v25, %v3522_v27 }
 0x119   :  { %2116 = vmatpush.bf16.msrb.mxu2 %v3653_v32  ;;  %2089 = vmatpush.bf16.msrb.mxu0 %v3109_v46  ;;  %v3778_v31 = vld [vmem:[#allocation6 + $0x6f8] sm:$0xf0]  ;;  %v3013_v32 = vor.u32 %v4197_v19, %v3010_v20  ;;  %v4751_v46 = vpop.f32.mrf.mxu2 }
 0x11a   :  { %2082 = vmatmul.bf16.vlgmr.msra.gmra.mxu3 %v4689_v15  ;;  %v4189_v37 = vld [vmem:[#allocation6 + $0x9c] sm:$0xf]  ;;  %v3781_v42 = vor.u32 %v4389_v29, %v3778_v31 }
 0x11b   :  { %2130 = vmatpush.bf16.msrb.mxu3 %v3909_v40  ;;  %2103 = vmatpush.bf16.msrb.mxu1 %v3365_v48  ;;  %v2978_v40 = vld [vmem:[#allocation6 + $0xb8] sm:$0xf0] }
 0x11c   :  { %v4253_v41 = vld [vmem:[#allocation6 + $0x29c] sm:$0xf]  ;;  %v2981_v53 = vor.u32 %v4189_v37, %v2978_v40 }
 0x11d   :  { %2117 = vmatpush.bf16.msrb.mxu2 %v3621_v49  ;;  %2090 = vmatpush.bf16.msrb.mxu0 %v3077_v62  ;;  %v4317_v44 = vld [vmem:[#allocation6 + $0x49c] sm:$0xf]  ;;  %v3237_v54 = vor.u32 %v4253_v41, %v3234_v43 }
 0x11e   :  { %v3490_v45 = vld [vmem:[#allocation6 + $0x4b8] sm:$0xf0] }
 0x11f   :  { %2131 = vmatpush.bf16.msrb.mxu3 %v3877_v55  ;;  %2104 = vmatpush.bf16.msrb.mxu1 %v3333_v0  ;;  %v4381_v48 = vld [vmem:[#allocation6 + $0x69c] sm:$0xf]  ;;  %v3493_v55 = vor.u32 %v4317_v44, %v3490_v45  ;;  %v4757_v4 = vpop.f32.mrf.mxu1  ;;  %v4761_v25 = vpop.f32.mrf.mxu3 }
 0x120   :  { %v3746_v49 = vld [vmem:[#allocation6 + $0x6b8] sm:$0xf0] }
 0x121   :  { %2118 = vmatpush.bf16.msrb.mxu2 %v3589_v1  ;;  %2091 = vmatpush.bf16.msrb.mxu0 %v3045_v16  ;;  %v4181_v56 = vld [vmem:[#allocation6 + $0x5c] sm:$0xf]  ;;  %v3749_v60 = vor.u32 %v4381_v48, %v3746_v49  ;;  %v4755_v1 = vpop.f32.mrf.mxu0  ;;  %v4431_v48 = vld [vmem:[#allocation9 + $0x28] sm:$0xff] }
 0x122   :  { %v2946_v58 = vld [vmem:[#allocation6 + $0x78] sm:$0xf0] }
 0x123   :  { %2132 = vmatpush.bf16.msrb.mxu3 %v3845_v5  ;;  %2105 = vmatpush.bf16.msrb.mxu1 %v3301_v17  ;;  %v4245_v59 = vld [vmem:[#allocation6 + $0x25c] sm:$0xf]  ;;  %v2949_v5 = vor.u32 %v4181_v56, %v2946_v58  ;;  %v1720_v56 = vadd.f32 %v4721_v38, %v4719_v36  ;;  %v1776_v58 = vadd.f32 %v4737_v50, %v4735_v47  ;;  %v4778_v47 = vld [vmem:[#allocation8] sm:$0xff] }
 0x124   :  { %v3202_v61 = vld [vmem:[#allocation6 + $0x278] sm:$0xf0]  ;;  %v1832_v36 = vadd.f32 %v4757_v4, %v4755_v1  ;;  %v4445_v1 = vld [vmem:[#allocation9 + $0x98] sm:$0xff] }
 0x125   :  { %2119 = vmatpush.bf16.msrb.mxu2 %v3557_v18  ;;  %2092 = vmatpush.bf16.msrb.mxu0 %v3013_v32  ;;  %v4309_v62 = vld [vmem:[#allocation6 + $0x45c] sm:$0xf]  ;;  %v3205_v7 = vor.u32 %v4245_v59, %v3202_v61  ;;  %v4433_v32 = vld [vmem:[#allocation9 + $0x38] sm:$0xff]  ;;  %v1778_v59 = vadd.f32 %v4749_v28, %v4747_v23  ;;  %v4446_v61 = vld [vmem:[#allocation9 + $0xa0] sm:$0xff]  ;;  %v1790_v23 = vadd.f32 %v4743_v63, %v1776_v58 }
 0x126   :  { %v3458_v0 = vld [vmem:[#allocation6 + $0x478] sm:$0xf0]  ;;  %v4453_v63 = vld [vmem:[#allocation9 + $0xd8] sm:$0xff] }
 0x127   :  { %2133 = vmatpush.bf16.msrb.mxu3 %v3813_v22  ;;  %2106 = vmatpush.bf16.msrb.mxu1 %v3269_v34  ;;  %v4373_v2 = vld [vmem:[#allocation6 + $0x65c] sm:$0xf]  ;;  %v3461_v10 = vor.u32 %v4309_v62, %v3458_v0  ;;  %v4759_v22 = vpop.f32.mrf.mxu2  ;;  %v4441_v34 = vld [vmem:[#allocation9 + $0x78] sm:$0xff]  ;;  %v1833_v40 = vpop.f32.mrf.mxu1  ;;  %v1734_v0 = vadd.f32 %v4723_v51, %v1720_v56  ;;  %v1792_v28 = vadd.f32 %v4751_v46, %v1778_v59 }
 0x128   :  { %v3714_v3 = vld [vmem:[#allocation6 + $0x678] sm:$0xf0]  ;;  %v1846_v51 = vadd.f32 %v4759_v22, %v1832_v36  ;;  %v4473_v36 = vld [vmem:[#allocation9 + $0x178] sm:$0xff] }
 0x129   :  { %2120 = vmatpush.bf16.msrb.mxu2 %v3525_v35  ;;  %2093 = vmatpush.bf16.msrb.mxu0 %v2981_v53  ;;  %v4173_v11 = vld [vmem:[#allocation6 + $0x1c] sm:$0xf]  ;;  %v3717_v16 = vor.u32 %v4373_v2, %v3714_v3  ;;  %v4449_v35 = vld [vmem:[#allocation9 + $0xb8] sm:$0xff]  ;;  %v1819_v37 = vpop.f32.mrf.mxu0  ;;  %v1861_v53 = vpop.f32.mrf.mxu3  ;;  %v4454_v2 = vld [vmem:[#allocation9 + $0xe0] sm:$0xff] }
 0x12a   :  { %v2914_v12 = vld [vmem:[#allocation6 + $0x38] sm:$0xf0]  ;;  %v1834_v38 = vadd.f32 %v1833_v40, %v1819_v37  ;;  %v4437_v3 = vld [vmem:[#allocation9 + $0x58] sm:$0xff]  ;;  %v1860_v22 = vadd.f32 %v4761_v25, %v1846_v51  ;;  %v4443_v37 = vld [vmem:[#allocation9 + $0x88] sm:$0xff] }
 0x12b   :  { %2134 = vmatpush.bf16.msrb.mxu3 %v3781_v42  ;;  %2107 = vmatpush.bf16.msrb.mxu1 %v3237_v54  ;;  %v4237_v13 = vld [vmem:[#allocation6 + $0x21c] sm:$0xf]  ;;  %v2917_v24 = vor.u32 %v4173_v11, %v2914_v12  ;;  %v4457_v42 = vld [vmem:[#allocation9 + $0xf8] sm:$0xff]  ;;  %v4439_v54 = vld [vmem:[#allocation9 + $0x68] sm:$0xff]  ;;  %v1748_v11 = vadd.f32 %v4725_v57, %v1734_v0  ;;  %v90_v57 = vperm.slane %v4778_v47, 2 }
 0x12c   :  { %v3170_v17 = vld [vmem:[#allocation6 + $0x238] sm:$0xf0]  ;;  %v4450_v0 = vld [vmem:[#allocation9 + $0xc0] sm:$0xff] }
 0x12d   :  { %2121 = vmatpush.bf16.msrb.mxu2 %v3493_v55  ;;  %v4301_v18 = vld [vmem:[#allocation6 + $0x41c] sm:$0xf]  ;;  %2094 = vmatpush.bf16.msrb.mxu0 %v2949_v5  ;;  %v3173_v27 = vor.u32 %v4237_v13, %v3170_v17  ;;  %v4447_v55 = vld [vmem:[#allocation9 + $0xa8] sm:$0xff]  ;;  %v1804_v17 = vadd.f32 %v4745_v6, %v1790_v23 }
 0x12e   :  { %v3426_v19 = vld [vmem:[#allocation6 + $0x438] sm:$0xf0] }
 0x12f   :  { %2135 = vmatpush.bf16.msrb.mxu3 %v3749_v60  ;;  %v4365_v20 = vld [vmem:[#allocation6 + $0x61c] sm:$0xf]  ;;  %2108 = vmatpush.bf16.msrb.mxu1 %v3205_v7  ;;  %v3429_v29 = vor.u32 %v4301_v18, %v3426_v19  ;;  %v1847_v45 = vpop.f32.mrf.mxu2  ;;  %v4438_v60 = vld [vmem:[#allocation9 + $0x60] sm:$0xff]  ;;  %v1806_v18 = vadd.f32 %v4753_v52, %v1792_v28  ;;  %v4463_v28 = vld [vmem:[#allocation9 + $0x128] sm:$0xff] }
 0x130   :  { %v3682_v21 = vld [vmem:[#allocation6 + $0x638] sm:$0xf0]  ;;  %v1848_v5 = vadd.f32 %v1847_v45, %v1834_v38 }
 0x131   :  { %2122 = vmatpush.bf16.msrb.mxu2 %v3461_v10  ;;  %v3685_v31 = vor.u32 %v4365_v20, %v3682_v21  ;;  %2095 = vmatpush.bf16.msrb.mxu0 %v2917_v24  ;;  %v4432_v41 = vld [vmem:[#allocation9 + $0x30] sm:$0xff]  ;;  %v88_v10 = vperm.slane %v4778_v47, 0 }
 0x132   :  { %v4440_v43 = vld [vmem:[#allocation9 + $0x70] sm:$0xff]  ;;  %v1862_v24 = vadd.f32 %v1861_v53, %v1848_v5  ;;  %v4451_v53 = vld [vmem:[#allocation9 + $0xc8] sm:$0xff] }
 0x133   :  { %2136 = vmatpush.bf16.msrb.mxu3 %v3717_v16  ;;  %2109 = vmatpush.bf16.msrb.mxu1 %v3173_v27  ;;  %v4448_v44 = vld [vmem:[#allocation9 + $0xb0] sm:$0xff]  ;;  %v1887_v62 = vpop.f32.mrf.mxu1  ;;  %v89_v16 = vperm.slane %v4778_v47, 1 }
 0x134   :  { %2096 = vmatmul.bf16.vlgmr.msrb.gmra.mxu0 %v4693_v26  ;;  %v4456_v49 = vld [vmem:[#allocation9 + $0xf0] sm:$0xff]  ;;  %v4430_v26 = vld [vmem:[#allocation9 + $0x20] sm:$0xff]  ;;  %v2154_v25 = vadd.f32 %v1862_v24, %v90_v57 }
 0x135   :  { %2123 = vmatpush.bf16.msrb.mxu2 %v3429_v29  ;;  %2735 = vmatpush.bf16.msra.mxu0 %v4433_v32  ;;  %v4436_v19 = vld [vmem:[#allocation9 + $0x50] sm:$0xff]  ;;  %v91_v29 = vperm.slane %v4778_v47, 3  ;;  %v2144_v32 = vadd.f32 %v1748_v11, %v88_v10 }
 0x136   :  { %2110 = vmatmul.bf16.vlgmr.msrb.gmra.mxu1 %v4695_v33  ;;  %v4455_v33 = vld [vmem:[#allocation9 + $0xe8] sm:$0xff]  ;;  %v4444_v20 = vld [vmem:[#allocation9 + $0x90] sm:$0xff]  ;;  %v2205_v58 = vmax.f32 %v2154_v25, 0.0 }
 0x137   :  { %2137 = vmatpush.bf16.msrb.mxu3 %v3685_v31  ;;  %2749 = vmatpush.bf16.msra.mxu1 %v4441_v34  ;;  %v4427_v31 = vld [vmem:[#allocation9 + $0x8] sm:$0xff]  ;;  %v4452_v6 = vld [vmem:[#allocation9 + $0xd0] sm:$0xff]  ;;  %v2145_v34 = vadd.f32 %v1804_v17, %v89_v16  ;;  %v92_v17 = vperm.slane %v4778_v47, 4 }
 0x138   :  { %2124 = vmatmul.bf16.vlgmr.msrb.gmra.mxu2 %v4687_v8  ;;  %v1873_v8 = vpop.f32.mrf.mxu0 }
 0x139   :  { %2763 = vmatpush.bf16.msra.mxu2 %v4449_v35  ;;  %2736 = vmatpush.bf16.msra.mxu0 %v4432_v41  ;;  %v4435_v35 = vld [vmem:[#allocation9 + $0x48] sm:$0xff]  ;;  %v2153_v41 = vadd.f32 %v1806_v18, %v89_v16  ;;  %v2196_v56 = vmax.f32 %v2145_v34, 0.0  ;;  %v4466_v34 = vld [vmem:[#allocation9 + $0x140] sm:$0xff] }
 0x13a   :  { %2138 = vmatmul.bf16.vlgmr.msrb.gmra.mxu3 %v4689_v15  ;;  %v1722_v15 = vadd.f32 %v4729_v14, %v4727_v9  ;;  %v1888_v9 = vadd.f32 %v1887_v62, %v1873_v8  ;;  %v4429_v14 = vld [vmem:[#allocation9 + $0x18] sm:$0xff] }
 0x13b   :  { %2777 = vmatpush.bf16.msra.mxu3 %v4457_v42  ;;  %2750 = vmatpush.bf16.msra.mxu1 %v4440_v43  ;;  %v1901_v4 = vpop.f32.mrf.mxu2  ;;  %v1889_v21 = vpop.f32.mrf.mxu1  ;;  %v2146_v42 = vadd.f32 %v1860_v22, %v90_v57  ;;  %v2204_v8 = vmax.f32 %v2153_v41, 0.0  ;;  %v4479_v41 = vld [vmem:[#allocation9 + $0x1a8] sm:$0xff] }
 0x13c   :  { %v1736_v50 = vadd.f32 %v4731_v30, %v1722_v15  ;;  %v1902_v12 = vadd.f32 %v1901_v4, %v1888_v9  ;;  %v4428_v30 = vld [vmem:[#allocation9 + $0x10] sm:$0xff]  ;;  %v4462_v4 = vld [vmem:[#allocation9 + $0x120] sm:$0xff] }
 0x13d   :  { %2764 = vmatpush.bf16.msra.mxu2 %v4448_v44  ;;  %2737 = vmatpush.bf16.msra.mxu0 %v4431_v48  ;;  %v1915_v7 = vpop.f32.mrf.mxu3  ;;  %v2197_v15 = vmax.f32 %v2146_v42, 0.0  ;;  %v2212_v9 = vpack.c.bf16 %v2204_v8, %v2196_v56  ;;  %v93_v56 = vperm.slane %v4778_v47, 5  ;;  %v4476_v8 = vld [vmem:[#allocation9 + $0x190] sm:$0xff] }
 0x13e   :  { %v1750_v46 = vadd.f32 %v4733_v39, %v1736_v50  ;;  %v1916_v39 = vadd.f32 %v1915_v7, %v1902_v12  ;;  %v4472_v50 = vld [vmem:[#allocation9 + $0x170] sm:$0xff]  ;;  %v4461_v7 = vld [vmem:[#allocation9 + $0x118] sm:$0xff] }
 0x13f   :  { %2778 = vmatpush.bf16.msra.mxu3 %v4456_v49  ;;  %2751 = vmatpush.bf16.msra.mxu1 %v4439_v54  ;;  %v4426_v49 = vld [vmem:[#allocation9] sm:$0xff]  ;;  %v2195_v54 = vmax.f32 %v2144_v32, 0.0 }
 0x140   :  { %v1875_v13 = vpop.f32.mrf.mxu0  ;;  %v2152_v52 = vadd.f32 %v1750_v46, %v88_v10  ;;  %v2147_v45 = vadd.f32 %v1916_v39, %v91_v29  ;;  %v4470_v10 = vld [vmem:[#allocation9 + $0x160] sm:$0xff]  ;;  %v4469_v46 = vld [vmem:[#allocation9 + $0x158] sm:$0xff] }
 0x141   :  { %2765 = vmatpush.bf16.msra.mxu2 %v4447_v55  ;;  %2738 = vmatpush.bf16.msra.mxu0 %v4430_v26  ;;  %v1890_v27 = vadd.f32 %v1889_v21, %v1875_v13  ;;  %v4434_v26 = vld [vmem:[#allocation9 + $0x40] sm:$0xff]  ;;  %v4460_v13 = vld [vmem:[#allocation9 + $0x110] sm:$0xff] }
 0x142   :  { %v2203_v55 = vmax.f32 %v2152_v52, 0.0  ;;  %v4468_v21 = vld [vmem:[#allocation9 + $0x150] sm:$0xff]  ;;  %v4458_v39 = vld [vmem:[#allocation9 + $0x100] sm:$0xff] }
 0x143   :  { %2779 = vmatpush.bf16.msra.mxu3 %v4455_v33  ;;  %2752 = vmatpush.bf16.msra.mxu1 %v4438_v60  ;;  %v1903_v40 = vpop.f32.mrf.mxu2  ;;  %v4442_v33 = vld [vmem:[#allocation9 + $0x80] sm:$0xff]  ;;  %v4465_v60 = vld [vmem:[#allocation9 + $0x138] sm:$0xff] }
 0x144   :  { %v1904_v43 = vadd.f32 %v1903_v40, %v1890_v27  ;;  %v2211_v38 = vpack.c.bf16 %v2203_v55, %v2195_v54  ;;  %v4480_v40 = vld [vmem:[#allocation9 + $0x1b0] sm:$0xff] }
 0x145   :  { %2766 = vmatpush.bf16.msra.mxu2 %v4446_v61  ;;  %2739 = vmatpush.bf16.msra.mxu0 %v4429_v14  ;;  %v1917_v44 = vpop.f32.mrf.mxu3  ;;  %v2198_v61 = vmax.f32 %v2147_v45, 0.0  ;;  %v2213_v14 = vpack.c.bf16 %v2205_v58, %v2197_v15 }
 0x146   :  { %v1918_v48 = vadd.f32 %v1917_v44, %v1904_v43  ;;  %v4478_v44 = vld [vmem:[#allocation9 + $0x1a0] sm:$0xff] }
 0x147   :  { %2780 = vmatpush.bf16.msra.mxu3 %v4454_v2  ;;  %2753 = vmatpush.bf16.msra.mxu1 %v4437_v3  ;;  %v4464_v2 = vld [vmem:[#allocation9 + $0x130] sm:$0xff]  ;;  %v4471_v3 = vld [vmem:[#allocation9 + $0x168] sm:$0xff] }
 0x148   :  { %v2155_v59 = vadd.f32 %v1918_v48, %v91_v29 }
 0x149   :  { %2767 = vmatpush.bf16.msra.mxu2 %v4445_v1  ;;  %2740 = vmatpush.bf16.msra.mxu0 %v4428_v30 }
 0x14a   :  { %v2206_v62 = vmax.f32 %v2155_v59, 0.0 }
 0x14b   :  { %2781 = vmatpush.bf16.msra.mxu3 %v4453_v63  ;;  %2754 = vmatpush.bf16.msra.mxu1 %v4436_v19 }
 0x14c   :  { %v2214_v23 = vpack.c.bf16 %v2206_v62, %v2198_v61  ;;  %v4475_v61 = vld [vmem:[#allocation9 + $0x188] sm:$0xff] }
 0x14d   :  { %2768 = vmatpush.bf16.msra.mxu2 %v4444_v20  ;;  %2741 = vmatpush.bf16.msra.mxu0 %v4427_v31  ;;  %v4459_v20 = vld [vmem:[#allocation9 + $0x108] sm:$0xff] }
 0x14e   :  { %v4467_v31 = vld [vmem:[#allocation9 + $0x148] sm:$0xff] }
 0x14f   :  { %2782 = vmatpush.bf16.msra.mxu3 %v4452_v6  ;;  %2755 = vmatpush.bf16.msra.mxu1 %v4435_v35  ;;  %v4481_v35 = vld [vmem:[#allocation9 + $0x1b8] sm:$0xff] }
 0x151   :  { %2769 = vmatpush.bf16.msra.mxu2 %v4443_v37  ;;  %2742 = vmatpush.bf16.msra.mxu0 %v4426_v49  ;;  %v1929_v1 = vpop.f32.mrf.mxu0 }
 0x153   :  { %2783 = vmatpush.bf16.msra.mxu3 %v4451_v53  ;;  %2756 = vmatpush.bf16.msra.mxu1 %v4434_v26  ;;  %v1943_v51 = vpop.f32.mrf.mxu1  ;;  %v4477_v53 = vld [vmem:[#allocation9 + $0x198] sm:$0xff] }
 0x154   :  { %2743 = vmatmul.bf16.vlgmr.msra.gmra.mxu0 %v2211_v38  ;;  %v1944_v5 = vadd.f32 %v1943_v51, %v1929_v1 }
 0x155   :  { %2770 = vmatpush.bf16.msra.mxu2 %v4442_v33  ;;  %2791 = vmatpush.bf16.msrb.mxu0 %v4465_v60 }
 0x156   :  { %2757 = vmatmul.bf16.vlgmr.msra.gmra.mxu1 %v2212_v9 }
 0x157   :  { %2805 = vmatpush.bf16.msrb.mxu1 %v4473_v36  ;;  %2784 = vmatpush.bf16.msra.mxu3 %v4450_v0  ;;  %v4474_v0 = vld [vmem:[#allocation9 + $0x180] sm:$0xff] }
 0x158   :  { %2771 = vmatmul.bf16.vlgmr.msra.gmra.mxu2 %v2213_v14  ;;  %v4489_v14 = vld [vmem:[#allocation9 + $0x1f8] sm:$0xff] }
 0x159   :  { %2792 = vmatpush.bf16.msrb.mxu0 %v4464_v2  ;;  %v1931_v63 = vpop.f32.mrf.mxu0  ;;  %2819 = vmatpush.bf16.msrb.mxu2 %v4481_v35 }
 0x15a   :  { %2785 = vmatmul.bf16.vlgmr.msra.gmra.mxu3 %v2214_v23  ;;  %v4487_v23 = vld [vmem:[#allocation9 + $0x1e8] sm:$0xff] }
 0x15b   :  { %2806 = vmatpush.bf16.msrb.mxu1 %v4472_v50  ;;  %v1957_v11 = vpop.f32.mrf.mxu2  ;;  %v1945_v16 = vpop.f32.mrf.mxu1  ;;  %2833 = vmatpush.bf16.msrb.mxu3 %v4489_v14  ;;  %v4488_v50 = vld [vmem:[#allocation9 + $0x1f0] sm:$0xff] }
 0x15c   :  { %v1958_v12 = vadd.f32 %v1957_v11, %v1944_v5  ;;  %v1946_v19 = vadd.f32 %v1945_v16, %v1931_v63 }
 0x15d   :  { %2793 = vmatpush.bf16.msrb.mxu0 %v4463_v28  ;;  %v1971_v30 = vpop.f32.mrf.mxu3  ;;  %2820 = vmatpush.bf16.msrb.mxu2 %v4480_v40  ;;  %v95_v40 = vperm.slane %v4778_v47, 7 }
 0x15e   :  { %v1972_v18 = vadd.f32 %v1971_v30, %v1958_v12  ;;  %v94_v30 = vperm.slane %v4778_v47, 6 }
 0x15f   :  { %2807 = vmatpush.bf16.msrb.mxu1 %v4471_v3  ;;  %2834 = vmatpush.bf16.msrb.mxu3 %v4488_v50 }
 0x160   :  { %v2148_v22 = vadd.f32 %v1972_v18, %v92_v17 }
 0x161   :  { %2794 = vmatpush.bf16.msrb.mxu0 %v4462_v4  ;;  %2821 = vmatpush.bf16.msrb.mxu2 %v4479_v41  ;;  %v4486_v4 = vld [vmem:[#allocation9 + $0x1e0] sm:$0xff] }
 0x162   :  { %v2199_v6 = vmax.f32 %v2148_v22, 0.0 }
 0x163   :  { %2808 = vmatpush.bf16.msrb.mxu1 %v4470_v10  ;;  %v1959_v57 = vpop.f32.mrf.mxu2  ;;  %2835 = vmatpush.bf16.msrb.mxu3 %v4487_v23  ;;  %v4485_v10 = vld [vmem:[#allocation9 + $0x1d8] sm:$0xff] }
 0x164   :  { %v1960_v24 = vadd.f32 %v1959_v57, %v1946_v19 }
 0x165   :  { %2795 = vmatpush.bf16.msrb.mxu0 %v4461_v7  ;;  %v1973_v27 = vpop.f32.mrf.mxu3  ;;  %2822 = vmatpush.bf16.msrb.mxu2 %v4478_v44 }
 0x166   :  { %v1974_v29 = vadd.f32 %v1973_v27, %v1960_v24  ;;  %v4482_v24 = vld [vmem:[#allocation9 + $0x1c0] sm:$0xff] }
 0x167   :  { %2809 = vmatpush.bf16.msrb.mxu1 %v4469_v46  ;;  %2836 = vmatpush.bf16.msrb.mxu3 %v4486_v4  ;;  %v4484_v46 = vld [vmem:[#allocation9 + $0x1d0] sm:$0xff] }
 0x168   :  { %v2156_v32 = vadd.f32 %v1974_v29, %v92_v17 }
 0x169   :  { %2796 = vmatpush.bf16.msrb.mxu0 %v4460_v13  ;;  %2823 = vmatpush.bf16.msrb.mxu2 %v4477_v53 }
 0x16a   :  { %v2207_v52 = vmax.f32 %v2156_v32, 0.0 }
 0x16b   :  { %2810 = vmatpush.bf16.msrb.mxu1 %v4468_v21  ;;  %2837 = vmatpush.bf16.msrb.mxu3 %v4485_v10 }
 0x16c   :  { %v2215_v37 = vpack.c.bf16 %v2207_v52, %v2199_v6 }
 0x16d   :  { %2797 = vmatpush.bf16.msrb.mxu0 %v4459_v20  ;;  %2824 = vmatpush.bf16.msrb.mxu2 %v4476_v8  ;;  %v4483_v20 = vld [vmem:[#allocation9 + $0x1c8] sm:$0xff]  ;;  %v4503_v8 = vld [vmem:[%s4807_s4] ss:$0 sm:$0xff]  ;;  %s4642_s4 = smov [#allocation11]  }
 0x16e   :  { %s2853_s17 = sshll.u32 %s4642_s4, 4  ;;  %s2854_s17 = int_to_ptr.vmem [resolvable:$true] %s2853_s17 }
 0x16f   :  { %2811 = vmatpush.bf16.msrb.mxu1 %v4467_v31  ;;  %2838 = vmatpush.bf16.msrb.mxu3 %v4484_v46 }
 0x171   :  { %2798 = vmatpush.bf16.msrb.mxu0 %v4458_v39  ;;  %v1985_v42 = vpop.f32.mrf.mxu0  ;;  %2825 = vmatpush.bf16.msrb.mxu2 %v4475_v61 }
 0x173   :  { %2812 = vmatpush.bf16.msrb.mxu1 %v4466_v34  ;;  %v1999_v25 = vpop.f32.mrf.mxu1  ;;  %2839 = vmatpush.bf16.msrb.mxu3 %v4483_v20 }
 0x174   :  { %2799 = vmatmul.bf16.vlgmr.msrb.gmra.mxu0 %v2215_v37  ;;  %v2000_v43 = vadd.f32 %v1999_v25, %v1985_v42 }
 0x175   :  { %2826 = vmatpush.bf16.msrb.mxu2 %v4474_v0 }
 0x177   :  { %2840 = vmatpush.bf16.msrb.mxu3 %v4482_v24 }
 0x179   :  { %v1987_v54 = vpop.f32.mrf.mxu0 }
 0x17b   :  { %v2013_v45 = vpop.f32.mrf.mxu2  ;;  %v2001_v55 = vpop.f32.mrf.mxu1 }
 0x17c   :  { %v2014_v48 = vadd.f32 %v2013_v45, %v2000_v43  ;;  %v2002_v33 = vadd.f32 %v2001_v55, %v1987_v54 }
 0x17d   :  { %v2027_v49 = vpop.f32.mrf.mxu3 }
 0x17e   :  { %v2028_v26 = vadd.f32 %v2027_v49, %v2014_v48 }
 0x180   :  { %v2149_v58 = vadd.f32 %v2028_v26, %v93_v56 }
 0x182   :  { %v2200_v36 = vmax.f32 %v2149_v58, 0.0 }
 0x183   :  { %v2015_v15 = vpop.f32.mrf.mxu2 }
 0x184   :  { %v2016_v59 = vadd.f32 %v2015_v15, %v2002_v33 }
 0x185   :  { %v2029_v60 = vpop.f32.mrf.mxu3 }
 0x186   :  { %v2030_v62 = vadd.f32 %v2029_v60, %v2016_v59 }
 0x188   :  { %v2157_v38 = vadd.f32 %v2030_v62, %v93_v56 }
 0x18a   :  { %v2208_v9 = vmax.f32 %v2157_v38, 0.0 }
 0x18c   :  { %v2216_v2 = vpack.c.bf16 %v2208_v9, %v2200_v36 }
 0x18e   :  { %2813 = vmatmul.bf16.vlgmr.msrb.gmra.mxu1 %v2216_v2 }
 0x191   :  { %v2041_v28 = vpop.f32.mrf.mxu0 }
 0x193   :  { %v2055_v3 = vpop.f32.mrf.mxu1 }
 0x194   :  { %v2056_v1 = vadd.f32 %v2055_v3, %v2041_v28 }
 0x199   :  { %v2043_v11 = vpop.f32.mrf.mxu0 }
 0x19b   :  { %v2069_v51 = vpop.f32.mrf.mxu2  ;;  %v2057_v12 = vpop.f32.mrf.mxu1 }
 0x19c   :  { %v2070_v5 = vadd.f32 %v2069_v51, %v2056_v1  ;;  %v2058_v13 = vadd.f32 %v2057_v12, %v2043_v11 }
 0x19d   :  { %v2083_v7 = vpop.f32.mrf.mxu3 }
 0x19e   :  { %v2084_v63 = vadd.f32 %v2083_v7, %v2070_v5 }
 0x1a0   :  { %v2150_v17 = vadd.f32 %v2084_v63, %v94_v30 }
 0x1a2   :  { %v2201_v57 = vmax.f32 %v2150_v17, 0.0 }
 0x1a3   :  { %v2071_v16 = vpop.f32.mrf.mxu2 }
 0x1a4   :  { %v2072_v18 = vadd.f32 %v2071_v16, %v2058_v13 }
 0x1a5   :  { %v2085_v19 = vpop.f32.mrf.mxu3 }
 0x1a6   :  { %v2086_v21 = vadd.f32 %v2085_v19, %v2072_v18 }
 0x1a8   :  { %v2158_v22 = vadd.f32 %v2086_v21, %v94_v30 }
 0x1aa   :  { %v2209_v27 = vmax.f32 %v2158_v22, 0.0 }
 0x1ac   :  { %v2217_v29 = vpack.c.bf16 %v2209_v27, %v2201_v57 }
 0x1ae   :  { %2827 = vmatmul.bf16.vlgmr.msrb.gmra.mxu2 %v2217_v29 }
 0x1b1   :  { %v2097_v39 = vpop.f32.mrf.mxu0 }
 0x1b3   :  { %v2111_v31 = vpop.f32.mrf.mxu1 }
 0x1b4   :  { %v2112_v6 = vadd.f32 %v2111_v31, %v2097_v39 }
 0x1b9   :  { %v2099_v35 = vpop.f32.mrf.mxu0 }
 0x1bb   :  { %v2125_v32 = vpop.f32.mrf.mxu2  ;;  %v2113_v37 = vpop.f32.mrf.mxu1 }
 0x1bc   :  { %v2126_v34 = vadd.f32 %v2125_v32, %v2112_v6  ;;  %v2114_v42 = vadd.f32 %v2113_v37, %v2099_v35 }
 0x1bd   :  { %v2139_v52 = vpop.f32.mrf.mxu3 }
 0x1be   :  { %v2140_v41 = vadd.f32 %v2139_v52, %v2126_v34 }
 0x1c0   :  { %v2151_v45 = vadd.f32 %v2140_v41, %v95_v40 }
 0x1c2   :  { %v2202_v53 = vmax.f32 %v2151_v45, 0.0 }
 0x1c3   :  { %v2127_v25 = vpop.f32.mrf.mxu2 }
 0x1c4   :  { %v2128_v43 = vadd.f32 %v2127_v25, %v2114_v42 }
 0x1c5   :  { %v2141_v44 = vpop.f32.mrf.mxu3 }
 0x1c6   :  { %v2142_v48 = vadd.f32 %v2141_v44, %v2128_v43 }
 0x1c8   :  { %v2159_v49 = vadd.f32 %v2142_v48, %v95_v40 }
 0x1ca   :  { %v2210_v54 = vmax.f32 %v2159_v49, 0.0 }
 0x1cc   :  { %v2218_v55 = vpack.c.bf16 %v2210_v54, %v2202_v53 }
 0x1ce   :  { %2841 = vmatmul.bf16.vlgmr.msrb.gmra.mxu3 %v2218_v55 }
 0x1d1   :  { %v2744_v56 = vpop.f32.mrf.mxu0 }
 0x1d2   :  { %v2745_v59 = vadd.f32 %v4503_v8, %v2744_v56 }
 0x1d3   :  { %v2758_v26 = vpop.f32.mrf.mxu1 }
 0x1d4   :  { %v2759_v61 = vadd.f32 %v2758_v26, %v2745_v59 }
 0x1d9   :  { %v2746_v47 = vpop.f32.mrf.mxu0 }
 0x1da   :  { %v2747_v9 = vadd.f32 %v4503_v8, %v2746_v47 }
 0x1db   :  { %v2772_v33 = vpop.f32.mrf.mxu2  ;;  %v2760_v58 = vpop.f32.mrf.mxu1 }
 0x1dc   :  { %v2773_v36 = vadd.f32 %v2772_v33, %v2759_v61  ;;  %v2761_v23 = vadd.f32 %v2760_v58, %v2747_v9 }
 0x1dd   :  { %v2786_v15 = vpop.f32.mrf.mxu3 }
 0x1de   :  { %v2787_v14 = vadd.f32 %v2786_v15, %v2773_v36 }
 0x1e3   :  { %v2774_v60 = vpop.f32.mrf.mxu2 }
 0x1e4   :  { %v2775_v3 = vadd.f32 %v2774_v60, %v2761_v23 }
 0x1e5   :  { %v2788_v38 = vpop.f32.mrf.mxu3 }
 0x1e6   :  { %v2789_v5 = vadd.f32 %v2788_v38, %v2775_v3 }
 0x1f1   :  { %v2800_v62 = vpop.f32.mrf.mxu0 }
 0x1f2   :  { %v2801_v50 = vadd.f32 %v2800_v62, %v2787_v14 }
 0x1f9   :  { %v2802_v4 = vpop.f32.mrf.mxu0 }
 0x1fa   :  { %v2803_v11 = vadd.f32 %v2802_v4, %v2789_v5 }
 0x20b   :  { %v2814_v0 = vpop.f32.mrf.mxu1 }
 0x20c   :  { %v2815_v28 = vadd.f32 %v2814_v0, %v2801_v50 }
 0x213   :  { %v2816_v10 = vpop.f32.mrf.mxu1 }
 0x214   :  { %v2817_v30 = vadd.f32 %v2816_v10, %v2803_v11 }
 0x231   :  { %v2828_v2 = vpop.f32.mrf.mxu2 }
 0x232   :  { %v2829_v1 = vadd.f32 %v2828_v2, %v2815_v28 }
 0x239   :  { %v2830_v12 = vpop.f32.mrf.mxu2 }
 0x23a   :  { %v2831_v63 = vadd.f32 %v2830_v12, %v2817_v30 }
 0x251   :  { %v2842_v51 = vpop.f32.mrf.mxu3 }
 0x252   :  { %v2843_v7 = vadd.f32 %v2842_v51, %v2829_v1 }
 0x254   :  { %2847 = vst [vmem:[#allocation11] sm:$0xff] %v2843_v7 }
 0x259   :  { %v2844_v13 = vpop.f32.mrf.mxu3 }
 0x25a   :  { %v2845_v46 = vadd.f32 %v2844_v13, %v2831_v63 }
 0x25c   :  { %2848 = vst [vmem:[#allocation11 + $0x8] sm:$0xff] %v2845_v46 }
 0x25d   :  { %2861 = dma.vmem_to_hbm [thread:$0]  %s2854_s17, 256, %s2856_s20, [#allocation5], %s4643_s21, %s4643_s21, %s4644_s22  }
 0x25e   :  { %4630 = dma.done.wait [#allocation5], 256  }
 0x25f   :  { %4631 = vsyncadd [#allocation5], 4294967040 }
 0x260   :  { %2866 = vsyncpa [#allocation4], 1 }
 0x261   :  { %2867 = vsyncpa [#allocation7], 1 }
 0x262   :  { %2868 = vsyncpa [#allocation10], 1 }
 0x263   :  { %2869 = vsyncpa [#allocation5], 1 }

</bundles_post_ra>
